<compile_context>
chip_gen: v6e
topology: v6e:2x2x1
jax: 0.10.0
libtpu: 0.0.40
codegen_flags: <defaults>
</compile_context>

<pallas_src>
import functools

import jax
import jax.numpy as jnp
from jax import lax
from jax.experimental import pallas as pl
from jax.experimental.pallas import tpu as pltpu

MASK_TOKEN_ID = 103


def _round_up(x, m):
    return ((x + m - 1) // m) * m


# --------------------- antonym masking (== _get_masked) ---------------------
# Plain XLA: a handful of VPU compares that fuse into the embedding gather.
def mask_antonyms(input_ids, antonym_ids):
    hit = (input_ids[:, :, None] == antonym_ids[None, None, :]).any(-1)
    return jnp.where(hit, jnp.int32(MASK_TOKEN_ID), input_ids)


# ------------- Kernel B: tiled MLM head matmul + online argmax -------------
def _mlm_argmax_kernel(x_ref, w_ref, pred_ref, max_ref, idx_ref, *,
                       v_real, dot_chunk):
    # grid = (M tiles [parallel], V tiles [arbitrary / reduction]).
    j = pl.program_id(1)

    @pl.when(j == 0)
    def _():
        max_ref[...] = jnp.full_like(max_ref, -jnp.inf)
        idx_ref[...] = jnp.zeros_like(idx_ref)

    x = x_ref[...]                                          # (tm, H) bf16
    tm = x.shape[0]
    tv = w_ref.shape[1]
    lane_iota = lax.broadcasted_iota(jnp.int32, (tm, 128), 1)   # hoisted once

    run_max = max_ref[...]                                  # (tm, 128) f32
    run_idx = idx_ref[...]                                  # (tm, 128) i32

    for c in range(tv // dot_chunk):                        # static, small
        # MXU-native chunk of the vocab matmul: only a (tm, dot_chunk) f32
        # window is live instead of the full (tm, tv) logits.
        logits = jnp.dot(x, w_ref[:, c * dot_chunk:(c + 1) * dot_chunk],
                         preferred_element_type=jnp.float32)
        for s in range(dot_chunk // 128):
            blk = logits[:, s * 128:(s + 1) * 128]          # (tm, 128)
            base = j * tv + c * dot_chunk + s * 128
            col = lane_iota + base
            if v_real is not None:                          # padded vocab cols
                blk = jnp.where(col < v_real, blk, -jnp.inf)
            # lane-carried online argmax: pure VPU compare/select; strict '>'
            # keeps the first-index tie-break across chunks / V tiles.
            better = blk > run_max
            run_max = jnp.where(better, blk, run_max)
            run_idx = jnp.where(better, col, run_idx)

    max_ref[...] = run_max
    idx_ref[...] = run_idx

    @pl.when(j == pl.num_programs(1) - 1)
    def _():
        # single cross-lane (XLU) reduce at the very end of the V sweep.
        fmax = jnp.max(run_max, axis=-1, keepdims=True)              # (tm, 1)
        sentinel = jnp.int32(2 ** 30)
        fidx = jnp.min(jnp.where(run_max == fmax, run_idx, sentinel),
                       axis=-1, keepdims=True)                       # first idx
        pred_ref[...] = fidx


def mlm_predict(hidden2d, w_vocab, *, tm_target=512, tv_target=1024,
                dot_chunk_target=256):
    M, H = hidden2d.shape
    H2, V = w_vocab.shape
    assert H2 == H

    if hidden2d.dtype != jnp.bfloat16:
        hidden2d = hidden2d.astype(jnp.bfloat16)
    if w_vocab.dtype != jnp.bfloat16:
        # Store w_vocab as bf16 in params (as done in __main__) so this cast
        # never runs; at BERT scale it is an extra full HBM pass per step.
        w_vocab = w_vocab.astype(jnp.bfloat16)

    # Tile sizes: rows padded to a multiple of tm, vocab padded to a multiple
    # of 128 / tv.  Padded columns are masked to -inf in the kernel so they
    # can never win the argmax; padded rows are sliced off below.
    tm = min(tm_target, _round_up(M, 8))        # on v7x keep M//tm >= 2 if possible
    M_pad = _round_up(M, tm)
    tv = min(tv_target, _round_up(V, 128))
    V_pad = _round_up(V, tv)
    dot_chunk = min(dot_chunk_target, tv)       # 256 on v6e/v7x; use 128 on v5e
    if tv % dot_chunk != 0:
        dot_chunk = 128

    if M_pad != M:
        hidden2d = jnp.pad(hidden2d, ((0, M_pad - M), (0, 0)))
    if V_pad != V:
        # TODO(synk): pre-pad w_vocab once in params at real-model scale.
        w_vocab = jnp.pad(w_vocab, ((0, 0), (0, V_pad - V)))

    kernel = functools.partial(_mlm_argmax_kernel,
                               v_real=(V if V_pad != V else None),
                               dot_chunk=dot_chunk)
    preds = pl.pallas_call(
        kernel,
        grid=(M_pad // tm, V_pad // tv),
        in_specs=[
            pl.BlockSpec((tm, H), lambda i, j: (i, 0)),
            # streamed vocab tile; on v5e consider pipeline_mode=pl.Buffered(3)
            pl.BlockSpec((H, tv), lambda i, j: (0, j)),
        ],
        # output block resident across the V axis; written at the last j step.
        out_specs=pl.BlockSpec((tm, 1), lambda i, j: (i, 0)),
        out_shape=jax.ShapeDtypeStruct((M_pad, 1), jnp.int32),
        scratch_shapes=[pltpu.VMEM((tm, 128), jnp.float32),
                        pltpu.VMEM((tm, 128), jnp.int32)],
        compiler_params=pltpu.CompilerParams(
            dimension_semantics=("parallel", "arbitrary")),
    )(hidden2d, w_vocab)
    return preds[:M, 0]


# ------- Kernel C: tiled cosine^2 masked sum (adv_loss numerator) -------
def _cos_sq_kernel(filt_ref, cand_ref, out_ref):
    f = filt_ref[...].astype(jnp.float32)                   # (tn, H)
    hdim = f.shape[1]
    k_cand = cand_ref.shape[1] // hdim
    ff = jnp.sum(f * f, axis=-1, keepdims=True)             # (tn, 1)

    c_all = cand_ref[...]                                    # (tn, K*H) bf16
    acc = jnp.zeros((), jnp.float32)
    for k in range(k_cand):                                  # static, small K
        ck = c_all[:, k * hdim:(k + 1) * hdim].astype(jnp.float32)
        dk = jnp.sum(f * ck, axis=-1, keepdims=True)
        cc = jnp.sum(ck * ck, axis=-1, keepdims=True)
        # cos^2 = dot^2 / (|f|^2 |c|^2): no sqrt.  Invalid candidates were
        # zeroed in the wrapper and padded rows are zero, so they add exactly 0.
        acc = acc + jnp.sum(dk * dk / jnp.maximum(ff * cc, 1e-12))
    out_ref[...] = acc[None, None]


def cosine_sq_sum(filt2d, cand2d, *, tn_target=512):
    N, H = filt2d.shape
    if filt2d.dtype != jnp.bfloat16:
        filt2d = filt2d.astype(jnp.bfloat16)
    if cand2d.dtype != jnp.bfloat16:
        cand2d = cand2d.astype(jnp.bfloat16)

    tn = min(tn_target, _round_up(N, 8))
    N_pad = _round_up(N, tn)
    if N_pad != N:
        filt2d = jnp.pad(filt2d, ((0, N_pad - N), (0, 0)))
        cand2d = jnp.pad(cand2d, ((0, N_pad - N), (0, 0)))
    g = N_pad // tn

    # Per-block partial sums on a 'parallel' grid axis (uses both TCs on v7x);
    # the tiny (g,)-sized reduction is done by the caller in XLA.
    parts = pl.pallas_call(
        _cos_sq_kernel,
        grid=(g,),
        in_specs=[
            pl.BlockSpec((tn, H), lambda i: (i, 0)),
            pl.BlockSpec((tn, cand2d.shape[1]), lambda i: (i, 0)),
        ],
        out_specs=pl.BlockSpec((1, 1), lambda i: (i, 0)),
        out_shape=jax.ShapeDtypeStruct((g, 1), jnp.float32),
        compiler_params=pltpu.CompilerParams(
            dimension_semantics=("parallel",),
            # 48 MiB is safe on v5e/v6e (128 MiB) and within v7x's 64 MiB.
            vmem_limit_bytes=48 * 1024 * 1024),
    )(filt2d, cand2d)
    return jnp.sum(parts)


# ---------------- Kernel D: SimCSE unsupervised contrastive loss ----------------
def _simcse_kernel(x_ref, xt_ref, out_ref):
    x = x_ref[...]                                          # (B, H) f32
    xt = xt_ref[...]                                        # (H, B) f32, pre-transposed
    # bf16 MXU matmul; normalization / softmax stay in f32.
    sim = jnp.dot(x.astype(jnp.bfloat16), xt.astype(jnp.bfloat16),
                  preferred_element_type=jnp.float32)       # (B, B)
    na = jnp.sqrt(jnp.sum(x * x, axis=-1, keepdims=True))   # (B, 1)
    nb = jnp.sqrt(jnp.sum(xt * xt, axis=0, keepdims=True))  # (1, B)
    sim = sim / jnp.maximum(na * nb, 1e-8)

    B = sim.shape[0]
    row = lax.broadcasted_iota(jnp.int32, (B, B), 0)
    col = lax.broadcasted_iota(jnp.int32, (B, B), 1)
    sim = jnp.where(row == col, sim - 1e12, sim) / 0.05
    # dropout-pair partner label; assumes an even, interleaved batch.
    label = row + 1 - (row % 2) * 2
    mx = jnp.max(sim, axis=-1, keepdims=True)
    lse = jnp.log(jnp.sum(jnp.exp(sim - mx), axis=-1, keepdims=True)) + mx
    pos = jnp.sum(jnp.where(col == label, sim, 0.0), axis=-1, keepdims=True)
    out_ref[...] = jnp.mean(lse - pos)[None, None]


def simcse_unsup_loss(out):
    # TODO(synk): for large configs pad B to a multiple of 8 / H to 128 (with
    # padded-row masking) before this call; full-array blocks are fine here.
    B, H = out.shape
    return pl.pallas_call(
        _simcse_kernel,
        grid=(1,),
        in_specs=[pl.BlockSpec((B, H), lambda i: (0, 0)),
                  pl.BlockSpec((H, B), lambda i: (0, 0))],
        out_specs=pl.BlockSpec((1, 1), lambda i: (0, 0)),
        out_shape=jax.ShapeDtypeStruct((1, 1), jnp.float32),
    )(out, out.T)


# ------------------------------- full forward -------------------------------
def token_rank_forward(params, out, input_ids, token_type_ids, attention_mask):
    word_emb = params["word_emb"]          # (V, H) f32
    type_emb = params["type_emb"]          # (2, H) f32
    w_vocab = params["w_vocab"]            # (H, V) bf16
    antonym_ids = params["antonym_ids"]    # (NA,) int32
    cand_table = params["cand_table"]      # (V, K) int32
    cand_count = params["cand_count"]      # (V,)   int32

    B, S = input_ids.shape
    V, H = word_emb.shape
    K = cand_table.shape[1]

    # _get_masked (fused XLA element-wise)
    masked_ids = mask_antonyms(input_ids, antonym_ids)

    # stand-in for BertForMaskedLM(input_ids, ..., cls_input=pooler_output)
    hidden = jnp.take(word_emb, masked_ids, axis=0)                    # (B, S, H)
    hidden = hidden + jnp.take(type_emb, token_type_ids, axis=0)
    hidden = hidden + out[:, None, :]                                  # cls_input injection
    hidden = hidden * attention_mask[..., None].astype(hidden.dtype)

    # prediction_scores -> word_predictions (Pallas kernel B, tiled + bf16)
    preds = mlm_predict(hidden.reshape(B * S, H), w_vocab).reshape(B, S)

    # get_masked equivalent with a static (V, K) candidate table + validity mask
    is_ant = (preds[..., None] == antonym_ids[None, None, :]).any(-1)  # (B, S)
    counts = jnp.take(cand_count, preds, axis=0)                       # (B, S)
    cands = jnp.take(cand_table, preds, axis=0)                        # (B, S, K)
    valid = is_ant[..., None] & (jnp.arange(K)[None, None, :] < counts[..., None])

    # one filt row per position; invalid candidate rows zeroed so cos == 0.
    # bf16 halves HBM traffic on the streaming kernel below.
    filt2d = jnp.take(word_emb, preds, axis=0).reshape(B * S, H).astype(jnp.bfloat16)
    cand_emb = jnp.take(word_emb, cands, axis=0).astype(jnp.bfloat16)  # (B, S, K, H)
    cand_emb = cand_emb * valid[..., None].astype(cand_emb.dtype)
    cand2d = cand_emb.reshape(B * S, K * H)                            # lane-dense slab

    num = cosine_sq_sum(filt2d, cand2d)                                # Pallas kernel C
    den = jnp.maximum(jnp.sum(valid.astype(jnp.float32)), 1.0)
    adv_loss = num / den                                               # masked MSE vs zeros

    simcse = simcse_unsup_loss(out)[0, 0]                              # Pallas kernel D
    return simcse + adv_loss * 0.5


if __name__ == "__main__":
    # small, forward-consistent shapes
    B, S, H, V, K, NA = 4, 16, 32, 128, 4, 8

    key = jax.random.PRNGKey(0)
    k_emb, k_type, k_vocab, k_cand, k_ids, k_out = jax.random.split(key, 6)

    antonym_ids = jnp.array([5, 9, 17, 23, 42, 57, 88, 101], dtype=jnp.int32)
    params = {
        "word_emb": 0.02 * jax.random.normal(k_emb, (V, H), jnp.float32),
        "type_emb": 0.02 * jax.random.normal(k_type, (2, H), jnp.float32),
        # stored bf16 so no per-step f32->bf16 HBM pass inside mlm_predict
        "w_vocab": (0.02 * jax.random.normal(k_vocab, (H, V), jnp.float32)
                    ).astype(jnp.bfloat16),
        "antonym_ids": antonym_ids,
        "cand_table": jax.random.randint(k_cand, (V, K), 0, V, dtype=jnp.int32),
        "cand_count": jnp.zeros((V,), jnp.int32).at[antonym_ids].set(
            jnp.array([2, 3, 4, 1, 2, 4, 3, 2], dtype=jnp.int32)),
    }

    input_ids = jax.random.randint(k_ids, (B, S), 0, V, dtype=jnp.int32)
    token_type_ids = jnp.zeros((B, S), jnp.int32)
    attention_mask = (jnp.arange(S)[None, :] < (S - 2)).astype(jnp.int32).repeat(B, axis=0)
    out = jax.random.normal(k_out, (B, H), jnp.float32)   # pooler_output

    fwd = jax.jit(functools.partial(token_rank_forward, params))
    loss = fwd(out, input_ids, token_type_ids, attention_mask)
    jax.block_until_ready(loss)
    assert loss.shape == () and jnp.isfinite(loss)
    print("KERNEL_OK")
</pallas_src>

<mosaic_0001>
module attributes {stable_mosaic.version = 11 : i64} {
  func.func @_mlm_argmax_kernel(%arg0: i32, %arg1: i32, %arg2: memref<64x32xbf16, #tpu.memory_space<vmem>>, %arg3: memref<32x128xbf16, #tpu.memory_space<vmem>>, %arg4: memref<64x1xi32, #tpu.memory_space<vmem>>, %arg5: memref<64x128xf32, #tpu.memory_space<vmem>>, %arg6: memref<64x128xi32, #tpu.memory_space<vmem>>) attributes {dimension_semantics = [#tpu.dimension_semantics<parallel>, #tpu.dimension_semantics<arbitrary>], iteration_bounds = array<i64: 1, 1>, scalar_prefetch = 0 : i64, scratch_operands = 2 : i64, tpu.core_type = #tpu.core_type<tc>, window_params = [{transform_indices = @transform_0, window_bounds = array<i64: 64, 32>}, {transform_indices = @transform_1, window_bounds = array<i64: 32, 128>}, {transform_indices = @transform_2, window_bounds = array<i64: 64, 1>}]} {
    %c0_i32 = arith.constant 0 : i32
    %0 = arith.cmpi eq, %arg1, %c0_i32 : i32
    %1 = arith.extui %0 : i1 to i32
    %c0_i32_0 = arith.constant 0 : i32
    %2 = arith.cmpi ne, %1, %c0_i32_0 : i32
    scf.if %2 {
      %cst_16 = arith.constant 0xFF800000 : f32
      %22 = vector.broadcast %cst_16 : f32 to vector<64x128xf32>
      %c0_17 = arith.constant 0 : index
      %c0_18 = arith.constant 0 : index
      %23 = vector.load %arg5[%c0_17, %c0_18] : memref<64x128xf32, #tpu.memory_space<vmem>>, vector<64x128xf32>
      tpu.vector_store %arg5[%c0_17, %c0_18], %22 {strides = array<i32>} : memref<64x128xf32, #tpu.memory_space<vmem>>, vector<64x128xf32>,
      %c0_i32_19 = arith.constant 0 : i32
      %24 = vector.broadcast %c0_i32_19 : i32 to vector<64x128xi32>
      %c0_20 = arith.constant 0 : index
      %c0_21 = arith.constant 0 : index
      %25 = vector.load %arg6[%c0_20, %c0_21] : memref<64x128xi32, #tpu.memory_space<vmem>>, vector<64x128xi32>
      tpu.vector_store %arg6[%c0_20, %c0_21], %24 {strides = array<i32>} : memref<64x128xi32, #tpu.memory_space<vmem>>, vector<64x128xi32>,
    } else {
    }
    %c0 = arith.constant 0 : index
    %c0_1 = arith.constant 0 : index
    %3 = vector.load %arg2[%c0, %c0_1] : memref<64x32xbf16, #tpu.memory_space<vmem>>, vector<64x32xbf16>
    %4 = tpu.iota {dimensions = array<i32: 1>} : vector<64x128xi32>
    %c0_2 = arith.constant 0 : index
    %c0_3 = arith.constant 0 : index
    %5 = vector.load %arg5[%c0_2, %c0_3] : memref<64x128xf32, #tpu.memory_space<vmem>>, vector<64x128xf32>
    %c0_4 = arith.constant 0 : index
    %c0_5 = arith.constant 0 : index
    %6 = vector.load %arg6[%c0_4, %c0_5] : memref<64x128xi32, #tpu.memory_space<vmem>>, vector<64x128xi32>
    %c0_6 = arith.constant 0 : index
    %c0_7 = arith.constant 0 : index
    %7 = vector.load %arg3[%c0_6, %c0_7] : memref<32x128xbf16, #tpu.memory_space<vmem>>, vector<32x128xbf16>
    %cst = arith.constant dense<0.000000e+00> : vector<64x128xf32>
    %8 = tpu.matmul %3, %7, %cst {dimension_numbers = #tpu.dot_dimension_numbers<[1], [0], [0], [1], [0, 0, 1, 1], [], []>} : vector<64x32xbf16>, vector<32x128xbf16>, vector<64x128xf32> -> vector<64x128xf32>
    %c128_i32 = arith.constant 128 : i32
    %9 = arith.muli %arg1, %c128_i32 : i32
    %c0_i32_8 = arith.constant 0 : i32
    %10 = arith.addi %9, %c0_i32_8 : i32
    %c0_i32_9 = arith.constant 0 : i32
    %11 = arith.addi %10, %c0_i32_9 : i32
    %12 = vector.broadcast %11 : i32 to vector<64x128xi32>
    %13 = arith.addi %4, %12 : vector<64x128xi32>
    %14 = arith.cmpf ogt, %8, %5 : vector<64x128xf32>
    %15 = arith.select %14, %8, %5 : vector<64x128xi1>, vector<64x128xf32>
    %16 = arith.select %14, %13, %6 : vector<64x128xi1>, vector<64x128xi32>
    %c0_10 = arith.constant 0 : index
    %c0_11 = arith.constant 0 : index
    %17 = vector.load %arg5[%c0_10, %c0_11] : memref<64x128xf32, #tpu.memory_space<vmem>>, vector<64x128xf32>
    tpu.vector_store %arg5[%c0_10, %c0_11], %15 {strides = array<i32>} : memref<64x128xf32, #tpu.memory_space<vmem>>, vector<64x128xf32>,
    %c0_12 = arith.constant 0 : index
    %c0_13 = arith.constant 0 : index
    %18 = vector.load %arg6[%c0_12, %c0_13] : memref<64x128xi32, #tpu.memory_space<vmem>>, vector<64x128xi32>
    tpu.vector_store %arg6[%c0_12, %c0_13], %16 {strides = array<i32>} : memref<64x128xi32, #tpu.memory_space<vmem>>, vector<64x128xi32>,
    %c0_i32_14 = arith.constant 0 : i32
    %19 = arith.cmpi eq, %arg1, %c0_i32_14 : i32
    %20 = arith.extui %19 : i1 to i32
    %c0_i32_15 = arith.constant 0 : i32
    %21 = arith.cmpi ne, %20, %c0_i32_15 : i32
    scf.if %21 {
      %cst_16 = arith.constant dense<0xFF800000> : vector<64xf32>
      %22 = vector.multi_reduction <maximumf>, %15, %cst_16 [1] : vector<64x128xf32> to vector<64xf32>
      %23 = vector.shape_cast %22 : vector<64xf32> to vector<64x1xf32>
      %24 = vector.broadcast %23 : vector<64x1xf32> to vector<64x128xf32>
      %25 = arith.cmpf oeq, %15, %24 : vector<64x128xf32>
      %c1073741824_i32 = arith.constant 1073741824 : i32
      %26 = vector.broadcast %c1073741824_i32 : i32 to vector<64x128xi32>
      %27 = arith.select %25, %16, %26 : vector<64x128xi1>, vector<64x128xi32>
      %cst_17 = arith.constant dense<2147483647> : vector<64xi32>
      %28 = vector.multi_reduction <minsi>, %27, %cst_17 [1] : vector<64x128xi32> to vector<64xi32>
      %29 = vector.shape_cast %28 : vector<64xi32> to vector<64x1xi32>
      %c0_18 = arith.constant 0 : index
      %c0_19 = arith.constant 0 : index
      %30 = vector.load %arg4[%c0_18, %c0_19] : memref<64x1xi32, #tpu.memory_space<vmem>>, vector<64x1xi32>
      tpu.vector_store %arg4[%c0_18, %c0_19], %29 {strides = array<i32>} : memref<64x1xi32, #tpu.memory_space<vmem>>, vector<64x1xi32>,
    } else {
    }
    return
  }
  func.func @transform_0(%arg0: i32, %arg1: i32) -> (i32, i32) {
    %c0_i32 = arith.constant 0 : i32
    %c0_i32_0 = arith.constant 0 : i32
    return %arg0, %c0_i32 : i32, i32
  }
  func.func @transform_1(%arg0: i32, %arg1: i32) -> (i32, i32) {
    %c0_i32 = arith.constant 0 : i32
    %c0_i32_0 = arith.constant 0 : i32
    return %c0_i32, %arg1 : i32, i32
  }
  func.func @transform_2(%arg0: i32, %arg1: i32) -> (i32, i32) {
    %c0_i32 = arith.constant 0 : i32
    %c0_i32_0 = arith.constant 0 : i32
    return %arg0, %c0_i32 : i32, i32
  }
}

module attributes {stable_mosaic.version = 11 : i64} {
  func.func @_cos_sq_kernel(%arg0: i32, %arg1: memref<64x32xbf16, #tpu.memory_space<vmem>>, %arg2: memref<64x128xbf16, #tpu.memory_space<vmem>>, %arg3: memref<1x1xf32, #tpu.memory_space<vmem>>) attributes {dimension_semantics = [#tpu.dimension_semantics<parallel>], iteration_bounds = array<i64: 1>, scalar_prefetch = 0 : i64, scratch_operands = 0 : i64, tpu.core_type = #tpu.core_type<tc>, window_params = [{transform_indices = @transform_0, window_bounds = array<i64: 64, 32>}, {transform_indices = @transform_1, window_bounds = array<i64: 64, 128>}, {transform_indices = @transform_2, window_bounds = array<i64: 1, 1>}]} {
    %c0 = arith.constant 0 : index
    %c0_0 = arith.constant 0 : index
    %0 = vector.load %arg1[%c0, %c0_0] : memref<64x32xbf16, #tpu.memory_space<vmem>>, vector<64x32xbf16>
    %1 = arith.extf %0 : vector<64x32xbf16> to vector<64x32xf32>
    %2 = arith.mulf %1, %1 : vector<64x32xf32>
    %cst = arith.constant dense<0.000000e+00> : vector<64xf32>
    %3 = vector.multi_reduction <add>, %2, %cst [1] : vector<64x32xf32> to vector<64xf32>
    %4 = vector.shape_cast %3 : vector<64xf32> to vector<64x1xf32>
    %c0_1 = arith.constant 0 : index
    %c0_2 = arith.constant 0 : index
    %5 = vector.load %arg2[%c0_1, %c0_2] : memref<64x128xbf16, #tpu.memory_space<vmem>>, vector<64x128xbf16>
    %6 = vector.extract_strided_slice %5 {offsets = [0, 0], sizes = [64, 32], strides = [1, 1]} : vector<64x128xbf16> to vector<64x32xbf16>
    %7 = arith.extf %6 : vector<64x32xbf16> to vector<64x32xf32>
    %8 = arith.mulf %1, %7 : vector<64x32xf32>
    %cst_3 = arith.constant dense<0.000000e+00> : vector<64xf32>
    %9 = vector.multi_reduction <add>, %8, %cst_3 [1] : vector<64x32xf32> to vector<64xf32>
    %10 = vector.shape_cast %9 : vector<64xf32> to vector<64x1xf32>
    %11 = arith.mulf %7, %7 : vector<64x32xf32>
    %cst_4 = arith.constant dense<0.000000e+00> : vector<64xf32>
    %12 = vector.multi_reduction <add>, %11, %cst_4 [1] : vector<64x32xf32> to vector<64xf32>
    %13 = vector.shape_cast %12 : vector<64xf32> to vector<64x1xf32>
    %14 = arith.mulf %10, %10 : vector<64x1xf32>
    %15 = arith.mulf %4, %13 : vector<64x1xf32>
    %cst_5 = arith.constant 9.99999996E-13 : f32
    %16 = vector.broadcast %cst_5 : f32 to vector<64x1xf32>
    %17 = arith.maximumf %15, %16 : vector<64x1xf32>
    %18 = arith.divf %14, %17 : vector<64x1xf32>
    %19 = vector.shape_cast %18 : vector<64x1xf32> to vector<1x64x1xf32>
    %cst_6 = arith.constant dense<0.000000e+00> : vector<1xf32>
    %20 = vector.multi_reduction <add>, %19, %cst_6 [1, 2] : vector<1x64x1xf32> to vector<1xf32>
    %21 = vector.shape_cast %20 : vector<1xf32> to vector<1x1x1xf32>
    %22 = vector.extract %21[0, 0, 0] : f32 from vector<1x1x1xf32>
    %cst_7 = arith.constant 0.000000e+00 : f32
    %23 = arith.addf %cst_7, %22 : f32
    %24 = vector.extract_strided_slice %5 {offsets = [0, 32], sizes = [64, 32], strides = [1, 1]} : vector<64x128xbf16> to vector<64x32xbf16>
    %25 = arith.extf %24 : vector<64x32xbf16> to vector<64x32xf32>
    %26 = arith.mulf %1, %25 : vector<64x32xf32>
    %cst_8 = arith.constant dense<0.000000e+00> : vector<64xf32>
    %27 = vector.multi_reduction <add>, %26, %cst_8 [1] : vector<64x32xf32> to vector<64xf32>
    %28 = vector.shape_cast %27 : vector<64xf32> to vector<64x1xf32>
    %29 = arith.mulf %25, %25 : vector<64x32xf32>
    %cst_9 = arith.constant dense<0.000000e+00> : vector<64xf32>
    %30 = vector.multi_reduction <add>, %29, %cst_9 [1] : vector<64x32xf32> to vector<64xf32>
    %31 = vector.shape_cast %30 : vector<64xf32> to vector<64x1xf32>
    %32 = arith.mulf %28, %28 : vector<64x1xf32>
    %33 = arith.mulf %4, %31 : vector<64x1xf32>
    %cst_10 = arith.constant 9.99999996E-13 : f32
    %34 = vector.broadcast %cst_10 : f32 to vector<64x1xf32>
    %35 = arith.maximumf %33, %34 : vector<64x1xf32>
    %36 = arith.divf %32, %35 : vector<64x1xf32>
    %37 = vector.shape_cast %36 : vector<64x1xf32> to vector<1x64x1xf32>
    %cst_11 = arith.constant dense<0.000000e+00> : vector<1xf32>
    %38 = vector.multi_reduction <add>, %37, %cst_11 [1, 2] : vector<1x64x1xf32> to vector<1xf32>
    %39 = vector.shape_cast %38 : vector<1xf32> to vector<1x1x1xf32>
    %40 = vector.extract %39[0, 0, 0] : f32 from vector<1x1x1xf32>
    %41 = arith.addf %23, %40 : f32
    %42 = vector.extract_strided_slice %5 {offsets = [0, 64], sizes = [64, 32], strides = [1, 1]} : vector<64x128xbf16> to vector<64x32xbf16>
    %43 = arith.extf %42 : vector<64x32xbf16> to vector<64x32xf32>
    %44 = arith.mulf %1, %43 : vector<64x32xf32>
    %cst_12 = arith.constant dense<0.000000e+00> : vector<64xf32>
    %45 = vector.multi_reduction <add>, %44, %cst_12 [1] : vector<64x32xf32> to vector<64xf32>
    %46 = vector.shape_cast %45 : vector<64xf32> to vector<64x1xf32>
    %47 = arith.mulf %43, %43 : vector<64x32xf32>
    %cst_13 = arith.constant dense<0.000000e+00> : vector<64xf32>
    %48 = vector.multi_reduction <add>, %47, %cst_13 [1] : vector<64x32xf32> to vector<64xf32>
    %49 = vector.shape_cast %48 : vector<64xf32> to vector<64x1xf32>
    %50 = arith.mulf %46, %46 : vector<64x1xf32>
    %51 = arith.mulf %4, %49 : vector<64x1xf32>
    %cst_14 = arith.constant 9.99999996E-13 : f32
    %52 = vector.broadcast %cst_14 : f32 to vector<64x1xf32>
    %53 = arith.maximumf %51, %52 : vector<64x1xf32>
    %54 = arith.divf %50, %53 : vector<64x1xf32>
    %55 = vector.shape_cast %54 : vector<64x1xf32> to vector<1x64x1xf32>
    %cst_15 = arith.constant dense<0.000000e+00> : vector<1xf32>
    %56 = vector.multi_reduction <add>, %55, %cst_15 [1, 2] : vector<1x64x1xf32> to vector<1xf32>
    %57 = vector.shape_cast %56 : vector<1xf32> to vector<1x1x1xf32>
    %58 = vector.extract %57[0, 0, 0] : f32 from vector<1x1x1xf32>
    %59 = arith.addf %41, %58 : f32
    %60 = vector.extract_strided_slice %5 {offsets = [0, 96], sizes = [64, 32], strides = [1, 1]} : vector<64x128xbf16> to vector<64x32xbf16>
    %61 = arith.extf %60 : vector<64x32xbf16> to vector<64x32xf32>
    %62 = arith.mulf %1, %61 : vector<64x32xf32>
    %cst_16 = arith.constant dense<0.000000e+00> : vector<64xf32>
    %63 = vector.multi_reduction <add>, %62, %cst_16 [1] : vector<64x32xf32> to vector<64xf32>
    %64 = vector.shape_cast %63 : vector<64xf32> to vector<64x1xf32>
    %65 = arith.mulf %61, %61 : vector<64x32xf32>
    %cst_17 = arith.constant dense<0.000000e+00> : vector<64xf32>
    %66 = vector.multi_reduction <add>, %65, %cst_17 [1] : vector<64x32xf32> to vector<64xf32>
    %67 = vector.shape_cast %66 : vector<64xf32> to vector<64x1xf32>
    %68 = arith.mulf %64, %64 : vector<64x1xf32>
    %69 = arith.mulf %4, %67 : vector<64x1xf32>
    %cst_18 = arith.constant 9.99999996E-13 : f32
    %70 = vector.broadcast %cst_18 : f32 to vector<64x1xf32>
    %71 = arith.maximumf %69, %70 : vector<64x1xf32>
    %72 = arith.divf %68, %71 : vector<64x1xf32>
    %73 = vector.shape_cast %72 : vector<64x1xf32> to vector<1x64x1xf32>
    %cst_19 = arith.constant dense<0.000000e+00> : vector<1xf32>
    %74 = vector.multi_reduction <add>, %73, %cst_19 [1, 2] : vector<1x64x1xf32> to vector<1xf32>
    %75 = vector.shape_cast %74 : vector<1xf32> to vector<1x1x1xf32>
    %76 = vector.extract %75[0, 0, 0] : f32 from vector<1x1x1xf32>
    %77 = arith.addf %59, %76 : f32
    %78 = vector.broadcast %77 : f32 to vector<1x1xf32>
    %c0_20 = arith.constant 0 : index
    %c0_21 = arith.constant 0 : index
    %79 = vector.load %arg3[%c0_20, %c0_21] : memref<1x1xf32, #tpu.memory_space<vmem>>, vector<1x1xf32>
    tpu.vector_store %arg3[%c0_20, %c0_21], %78 {strides = array<i32>} : memref<1x1xf32, #tpu.memory_space<vmem>>, vector<1x1xf32>,
    return
  }
  func.func @transform_0(%arg0: i32) -> (i32, i32) {
    %c0_i32 = arith.constant 0 : i32
    %c0_i32_0 = arith.constant 0 : i32
    return %arg0, %c0_i32 : i32, i32
  }
  func.func @transform_1(%arg0: i32) -> (i32, i32) {
    %c0_i32 = arith.constant 0 : i32
    %c0_i32_0 = arith.constant 0 : i32
    return %arg0, %c0_i32 : i32, i32
  }
  func.func @transform_2(%arg0: i32) -> (i32, i32) {
    %c0_i32 = arith.constant 0 : i32
    %c0_i32_0 = arith.constant 0 : i32
    return %arg0, %c0_i32 : i32, i32
  }
}

module attributes {stable_mosaic.version = 11 : i64} {
  func.func @_simcse_kernel(%arg0: i32, %arg1: memref<4x32xf32, #tpu.memory_space<vmem>>, %arg2: memref<32x4xf32, #tpu.memory_space<vmem>>, %arg3: memref<1x1xf32, #tpu.memory_space<vmem>>) attributes {dimension_semantics = [#tpu.dimension_semantics<arbitrary>], iteration_bounds = array<i64: 1>, scalar_prefetch = 0 : i64, scratch_operands = 0 : i64, tpu.core_type = #tpu.core_type<tc>, window_params = [{pipeline_mode = #tpu.pipeline_mode<synchronous>, transform_indices = @transform_0, window_bounds = array<i64: 4, 32>}, {pipeline_mode = #tpu.pipeline_mode<synchronous>, transform_indices = @transform_1, window_bounds = array<i64: 32, 4>}, {pipeline_mode = #tpu.pipeline_mode<synchronous>, transform_indices = @transform_2, window_bounds = array<i64: 1, 1>}]} {
    %c0 = arith.constant 0 : index
    %c0_0 = arith.constant 0 : index
    %0 = vector.load %arg1[%c0, %c0_0] : memref<4x32xf32, #tpu.memory_space<vmem>>, vector<4x32xf32>
    %c0_1 = arith.constant 0 : index
    %c0_2 = arith.constant 0 : index
    %1 = vector.load %arg2[%c0_1, %c0_2] : memref<32x4xf32, #tpu.memory_space<vmem>>, vector<32x4xf32>
    %2 = arith.truncf %0 : vector<4x32xf32> to vector<4x32xbf16>
    %3 = arith.truncf %1 : vector<32x4xf32> to vector<32x4xbf16>
    %cst = arith.constant dense<0.000000e+00> : vector<4x4xf32>
    %4 = tpu.matmul %2, %3, %cst {dimension_numbers = #tpu.dot_dimension_numbers<[1], [0], [0], [1], [0, 0, 1, 1], [], []>} : vector<4x32xbf16>, vector<32x4xbf16>, vector<4x4xf32> -> vector<4x4xf32>
    %5 = arith.mulf %0, %0 : vector<4x32xf32>
    %cst_3 = arith.constant dense<0.000000e+00> : vector<4xf32>
    %6 = vector.multi_reduction <add>, %5, %cst_3 [1] : vector<4x32xf32> to vector<4xf32>
    %7 = vector.shape_cast %6 : vector<4xf32> to vector<4x1xf32>
    %8 = math.sqrt %7 : vector<4x1xf32>
    %9 = arith.mulf %1, %1 : vector<32x4xf32>
    %cst_4 = arith.constant dense<0.000000e+00> : vector<4xf32>
    %10 = vector.multi_reduction <add>, %9, %cst_4 [0] : vector<32x4xf32> to vector<4xf32>
    %11 = vector.shape_cast %10 : vector<4xf32> to vector<1x4xf32>
    %12 = math.sqrt %11 : vector<1x4xf32>
    %13 = vector.broadcast %8 : vector<4x1xf32> to vector<4x4xf32>
    %14 = vector.broadcast %12 : vector<1x4xf32> to vector<4x4xf32>
    %15 = arith.mulf %13, %14 : vector<4x4xf32>
    %cst_5 = arith.constant 9.99999993E-9 : f32
    %16 = vector.broadcast %cst_5 : f32 to vector<4x4xf32>
    %17 = arith.maximumf %15, %16 : vector<4x4xf32>
    %18 = arith.divf %4, %17 : vector<4x4xf32>
    %19 = tpu.iota {dimensions = array<i32: 0>} : vector<4x4xi32>
    %20 = tpu.iota {dimensions = array<i32: 1>} : vector<4x4xi32>
    %21 = arith.cmpi eq, %19, %20 : vector<4x4xi32>
    %cst_6 = arith.constant 9.99999995E+11 : f32
    %22 = vector.broadcast %cst_6 : f32 to vector<4x4xf32>
    %23 = arith.subf %18, %22 : vector<4x4xf32>
    %24 = arith.select %21, %23, %18 : vector<4x4xi1>, vector<4x4xf32>
    %cst_7 = arith.constant 5.000000e-02 : f32
    %25 = vector.broadcast %cst_7 : f32 to vector<4x4xf32>
    %26 = arith.divf %24, %25 : vector<4x4xf32>
    %c1_i32 = arith.constant 1 : i32
    %27 = vector.broadcast %c1_i32 : i32 to vector<4x4xi32>
    %28 = arith.addi %19, %27 : vector<4x4xi32>
    %c2_i32 = arith.constant 2 : i32
    %c0_i32 = arith.constant 0 : i32
    %29 = arith.cmpi eq, %c2_i32, %c0_i32 : i32
    %c1_i32_8 = arith.constant 1 : i32
    %30 = arith.select %29, %c1_i32_8, %c2_i32 : i32
    %31 = vector.broadcast %30 : i32 to vector<4x4xi32>
    %32 = arith.remsi %19, %31 : vector<4x4xi32>
    %c0_i32_9 = arith.constant 0 : i32
    %33 = vector.broadcast %c0_i32_9 : i32 to vector<4x4xi32>
    %34 = arith.cmpi ne, %32, %33 : vector<4x4xi32>
    %c0_i32_10 = arith.constant 0 : i32
    %35 = vector.broadcast %c0_i32_10 : i32 to vector<4x4xi32>
    %36 = arith.cmpi slt, %32, %35 : vector<4x4xi32>
    %c0_i32_11 = arith.constant 0 : i32
    %37 = arith.cmpi slt, %30, %c0_i32_11 : i32
    %38 = vector.broadcast %37 : i1 to vector<4x4xi1>
    %39 = vector.broadcast %38 : vector<4x4xi1> to vector<4x4xi1>
    %40 = arith.xori %36, %39 : vector<4x4xi1>
    %41 = arith.andi %40, %34 : vector<4x4xi1>
    %42 = vector.broadcast %30 : i32 to vector<4x4xi32>
    %43 = arith.addi %32, %42 : vector<4x4xi32>
    %44 = arith.select %41, %43, %32 : vector<4x4xi1>, vector<4x4xi32>
    %c2_i32_12 = arith.constant 2 : i32
    %45 = vector.broadcast %c2_i32_12 : i32 to vector<4x4xi32>
    %46 = arith.muli %44, %45 : vector<4x4xi32>
    %47 = arith.subi %28, %46 : vector<4x4xi32>
    %cst_13 = arith.constant dense<0xFF800000> : vector<4xf32>
    %48 = vector.multi_reduction <maximumf>, %26, %cst_13 [1] : vector<4x4xf32> to vector<4xf32>
    %49 = vector.shape_cast %48 : vector<4xf32> to vector<4x1xf32>
    %50 = vector.broadcast %49 : vector<4x1xf32> to vector<4x4xf32>
    %51 = arith.subf %26, %50 : vector<4x4xf32>
    %52 = math.exp %51 : vector<4x4xf32>
    %cst_14 = arith.constant dense<0.000000e+00> : vector<4xf32>
    %53 = vector.multi_reduction <add>, %52, %cst_14 [1] : vector<4x4xf32> to vector<4xf32>
    %54 = vector.shape_cast %53 : vector<4xf32> to vector<4x1xf32>
    %55 = math.log %54 : vector<4x1xf32>
    %56 = arith.addf %55, %49 : vector<4x1xf32>
    %57 = arith.cmpi eq, %20, %47 : vector<4x4xi32>
    %cst_15 = arith.constant 0.000000e+00 : f32
    %58 = vector.broadcast %cst_15 : f32 to vector<4x4xf32>
    %59 = arith.select %57, %26, %58 : vector<4x4xi1>, vector<4x4xf32>
    %cst_16 = arith.constant dense<0.000000e+00> : vector<4xf32>
    %60 = vector.multi_reduction <add>, %59, %cst_16 [1] : vector<4x4xf32> to vector<4xf32>
    %61 = vector.shape_cast %60 : vector<4xf32> to vector<4x1xf32>
    %62 = arith.subf %56, %61 : vector<4x1xf32>
    %63 = vector.shape_cast %62 : vector<4x1xf32> to vector<1x4x1xf32>
    %cst_17 = arith.constant dense<0.000000e+00> : vector<1xf32>
    %64 = vector.multi_reduction <add>, %63, %cst_17 [1, 2] : vector<1x4x1xf32> to vector<1xf32>
    %65 = vector.shape_cast %64 : vector<1xf32> to vector<1x1x1xf32>
    %66 = vector.extract %65[0, 0, 0] : f32 from vector<1x1x1xf32>
    %cst_18 = arith.constant 4.000000e+00 : f32
    %67 = arith.divf %66, %cst_18 : f32
    %68 = vector.broadcast %67 : f32 to vector<1x1xf32>
    %c0_19 = arith.constant 0 : index
    %c0_20 = arith.constant 0 : index
    %69 = vector.load %arg3[%c0_19, %c0_20] : memref<1x1xf32, #tpu.memory_space<vmem>>, vector<1x1xf32>
    tpu.vector_store %arg3[%c0_19, %c0_20], %68 {strides = array<i32>} : memref<1x1xf32, #tpu.memory_space<vmem>>, vector<1x1xf32>,
    return
  }
  func.func @transform_0(%arg0: i32) -> (i32, i32) {
    %c0_i32 = arith.constant 0 : i32
    %c0_i32_0 = arith.constant 0 : i32
    %c0_i32_1 = arith.constant 0 : i32
    return %c0_i32, %c0_i32_0 : i32, i32
  }
  func.func @transform_1(%arg0: i32) -> (i32, i32) {
    %c0_i32 = arith.constant 0 : i32
    %c0_i32_0 = arith.constant 0 : i32
    %c0_i32_1 = arith.constant 0 : i32
    return %c0_i32, %c0_i32_0 : i32, i32
  }
  func.func @transform_2(%arg0: i32) -> (i32, i32) {
    %c0_i32 = arith.constant 0 : i32
    %c0_i32_0 = arith.constant 0 : i32
    %c0_i32_1 = arith.constant 0 : i32
    return %c0_i32, %c0_i32_0 : i32, i32
  }
}

</mosaic_0001>

<bundles_post_ra>
// kernel: token_rank_forward.3
= control target key start
LH: loop header
LB: loop body
LE: loop exit
PB: predicated region body
PF: predicated region fallthrough
CT: control target
= control target key end

     0   :  { %vm94_vm0 = vcmask 261120   ;;  %v40_v22 = vlaneseq  ;;  %s506_s1 = inlined_call_operand.vmem [shape: bf16[32,128], index: 1, kind: input, shape index: {}]   ;;  %s507_s0 = inlined_call_operand.vmem [shape: bf16[64,32], index: 0, kind: input, shape index: {}]   ;;  %s508_s2 = inlined_call_operand.vmem [shape: s32[64,1], index: 2, kind: output, shape index: {}]  }
   0x1   :  { %v407_v0 = vld [vmem:[%s506_s1 + $0x8] sm:$0xff]   ;;  %v408_v1 = vld [vmem:[%s506_s1] sm:$0xff]   ;;  %v410_v3 = vld [vmem:[%s507_s0 + $0x10] sm:$0xff]  }
   0x2   :  { %391 = vmatprep.subr.bf16.mxu0 %v407_v0  ;;  %403 = vmatprep.subr.bf16.mxu1 %v407_v0  ;;  %v409_v2 = vld [vmem:[%s507_s0] sm:$0xff]   ;;  %v411_v4 = vld [vmem:[%s507_s0 + $0x8] sm:$0xff]   ;;  %v412_v5 = vld [vmem:[%s507_s0 + $0x18] sm:$0xff]   ;;  %v41_v23 = vand.u32 127, %v40_v22 }
   0x3   :  { %392 = vmatpush3.bf16.msra.mxu0 %v407_v0  ;;  %405 = vmatpush3.bf16.msra.mxu1 %v407_v0 }
   0x4   :  { %393 = vmatprep.subr.bf16.mxu0 %v408_v1  ;;  %404 = vmatprep.subr.bf16.mxu1 %v408_v1 }
   0x5   :  { %395 = vmatprep.mubr.msk.bf16.mxu0 %vm94_vm0, %v409_v2  ;;  %399 = vmatprep.mubr.msk.bf16.mxu1 %vm94_vm0, %v410_v3 }
   0x7   :  { %394 = vmatpush3.bf16.msra.mxu0 %v408_v1  ;;  %406 = vmatpush3.bf16.msra.mxu1 %v408_v1 }
   0xa   :  { %396 = vmatmul.mubr.msk.bf16.vlgmr.msra.gmra.mxu0 %vm94_vm0, %v411_v4  ;;  %400 = vmatmul.mubr.msk.bf16.vlgmr.msra.gmra.mxu1 %vm94_vm0, %v412_v5 }
  0xca   :  { %v397_v6 = vpop.f32.mrf.mxu0  ;;  %v446_v7 = vpop.f32.mrf.mxu1 }
  0xcb   :  { %vm177_vm1 = vcmp.gt.f32.partialorder %v397_v6, -inf  ;;  %vm181_vm8 = vcmp.gt.f32.partialorder %v446_v7, -inf }
  0xcc   :  { %v141_v8 = vpop.f32.mrf.mxu0  ;;  %v157_v9 = vpop.f32.mrf.mxu1  ;;  %v185_v10 = vsel %vm177_vm1, %v397_v6, -inf  ;;  %v189_v21 = vsel %vm181_vm8, %v446_v7, -inf  ;;  %v193_v25 = vsel %vm177_vm1, %v41_v23, 0  ;;  %v197_v52 = vsel %vm181_vm8, %v41_v23, 0 }
  0xcd   :  { %222 = vmax.xlane.f32.xlu1 %v185_v10  ;;  %vm175_vm2 = vcmp.gt.f32.partialorder %v141_v8, -inf  ;;  %vm179_vm4 = vcmp.gt.f32.partialorder %v157_v9, -inf }
  0xce   :  { %v398_v11 = vpop.f32.mrf.mxu0  ;;  %v449_v12 = vpop.f32.mrf.mxu1  ;;  %v183_v13 = vsel %vm175_vm2, %v141_v8, -inf  ;;  %v187_v17 = vsel %vm179_vm4, %v157_v9, -inf  ;;  %v191_v28 = vsel %vm175_vm2, %v41_v23, 0  ;;  %v195_v37 = vsel %vm179_vm4, %v41_v23, 0 }
  0xcf   :  { %218 = vmax.xlane.f32.xlu0 %v183_v13  ;;  %vm178_vm3 = vcmp.gt.f32.partialorder %v398_v11, -inf  ;;  %vm182_vm7 = vcmp.gt.f32.partialorder %v449_v12, -inf }
  0xd0   :  { %v144_v14 = vpop.f32.mrf.mxu0  ;;  %v160_v15 = vpop.f32.mrf.mxu1  ;;  %v186_v16 = vsel %vm178_vm3, %v398_v11, -inf  ;;  %v190_v20 = vsel %vm182_vm7, %v449_v12, -inf  ;;  %v194_v32 = vsel %vm178_vm3, %v41_v23, 0  ;;  %v198_v54 = vsel %vm182_vm7, %v41_v23, 0 }
  0xd1   :  { %vm180_vm5 = vcmp.gt.f32.partialorder %v160_v15, -inf  ;;  %224 = vmax.xlane.f32.xlu1 %v186_v16  ;;  %vm176_vm6 = vcmp.gt.f32.partialorder %v144_v14, -inf }
  0xd2   :  { %v188_v18 = vsel %vm180_vm5, %v160_v15, -inf  ;;  %v184_v19 = vsel %vm176_vm6, %v144_v14, -inf  ;;  %v192_v45 = vsel %vm176_vm6, %v41_v23, 0  ;;  %v196_v46 = vsel %vm180_vm5, %v41_v23, 0 }
  0xd3   :  { %226 = vmax.xlane.f32.xlu0 %v187_v17 }
  0xd5   :  { %228 = vmax.xlane.f32.xlu1 %v188_v18 }
  0xd7   :  { %220 = vmax.xlane.f32.xlu0 %v184_v19 }
  0xd9   :  { %232 = vmax.xlane.f32.xlu1 %v190_v20 }
  0xdb   :  { %230 = vmax.xlane.f32.xlu0 %v189_v21 }
 0x156   :  { %v223_v24 = vpop.xlane.xlu1 %222 }
 0x157   :  { %vm236_vm9 = vcmp.eq.f32.partialorder %v185_v10, %v223_v24 }
 0x158   :  { %v244_v26 = vsel %vm236_vm9, %v193_v25, 1073741824  ;;  %v219_v27 = vpop.xlane.xlu0 %218  ;;  %vm362_vm9 = vcmask 7168  }
 0x159   :  { %vm234_vm10 = vcmp.eq.f32.partialorder %v183_v13, %v219_v27  ;;  %v279_v29 = vshra.s32 %v244_v26, 16  ;;  %v278_v0 = vand.u32 65535, %v244_v26 }
 0x15a   :  { %v242_v30 = vsel %vm234_vm10, %v191_v28, 1073741824  ;;  %v225_v31 = vpop.xlane.xlu1 %224 }
 0x15b   :  { %vm237_vm11 = vcmp.eq.f32.partialorder %v186_v16, %v225_v31  ;;  %v281_v33 = vcvt.s32.f32 %v279_v29  ;;  %v251_v34 = vshra.s32 %v242_v30, 16  ;;  %v250_v1 = vand.u32 65535, %v242_v30 }
 0x15c   :  { %v245_v35 = vsel %vm237_vm11, %v194_v32, 1073741824  ;;  %v227_v36 = vpop.xlane.xlu0 %226  ;;  %v280_v4 = vcvt.s32.f32 %v278_v0 }
 0x15d   :  { %vm238_vm12 = vcmp.eq.f32.partialorder %v187_v17, %v227_v36  ;;  %282 = vmin.xlane.f32.xlu0 %v281_v33  ;;  %v293_v38 = vshra.s32 %v245_v35, 16  ;;  %v253_v42 = vcvt.s32.f32 %v251_v34  ;;  %v292_v2 = vand.u32 65535, %v245_v35 }
 0x15e   :  { %v246_v39 = vsel %vm238_vm12, %v195_v37, 1073741824  ;;  %v229_v40 = vpop.xlane.xlu1 %228  ;;  %v252_v10 = vcvt.s32.f32 %v250_v1 }
 0x15f   :  { %vm239_vm13 = vcmp.eq.f32.partialorder %v188_v18, %v229_v40  ;;  %v295_v41 = vcvt.s32.f32 %v293_v38  ;;  %v307_v43 = vshra.s32 %v246_v39, 16  ;;  %v306_v6 = vand.u32 65535, %v246_v39 }
 0x160   :  { %v221_v44 = vpop.xlane.xlu0 %220  ;;  %v247_v47 = vsel %vm239_vm13, %v196_v46, 1073741824  ;;  %v294_v9 = vcvt.s32.f32 %v292_v2 }
 0x161   :  { %vm235_vm14 = vcmp.eq.f32.partialorder %v184_v19, %v221_v44  ;;  %296 = vmin.xlane.f32.xlu1 %v295_v41  ;;  %254 = vmin.xlane.f32.xlu0 %v253_v42  ;;  %v309_v50 = vcvt.s32.f32 %v307_v43  ;;  %v321_v56 = vshra.s32 %v247_v47, 16  ;;  %v308_v15 = vcvt.s32.f32 %v306_v6 }
 0x162   :  { %v243_v48 = vsel %vm235_vm14, %v192_v45, 1073741824  ;;  %v233_v49 = vpop.xlane.xlu1 %232  ;;  %v320_v16 = vand.u32 65535, %v247_v47 }
 0x163   :  { %vm241_vm15 = vcmp.eq.f32.partialorder %v190_v20, %v233_v49  ;;  %v265_v51 = vshra.s32 %v243_v48, 16  ;;  %v323_v60 = vcvt.s32.f32 %v321_v56  ;;  %v264_v11 = vand.u32 65535, %v243_v48 }
 0x164   :  { %v231_v53 = vpop.xlane.xlu0 %230  ;;  %v249_v57 = vsel %vm241_vm15, %v198_v54, 1073741824  ;;  %v322_v25 = vcvt.s32.f32 %v320_v16 }
 0x165   :  { %vm240_vm0 = vcmp.eq.f32.partialorder %v189_v21, %v231_v53  ;;  %310 = vmin.xlane.f32.xlu0 %v309_v50  ;;  %v267_v55 = vcvt.s32.f32 %v265_v51  ;;  %v349_v62 = vshra.s32 %v249_v57, 16  ;;  %v266_v20 = vcvt.s32.f32 %v264_v11 }
 0x166   :  { %v248_v58 = vsel %vm240_vm0, %v197_v52, 1073741824  ;;  %v348_v22 = vand.u32 65535, %v249_v57 }
 0x167   :  { %268 = vmin.xlane.f32.xlu1 %v267_v55  ;;  %v335_v59 = vshra.s32 %v248_v58, 16  ;;  %v351_v63 = vcvt.s32.f32 %v349_v62  ;;  %v334_v17 = vand.u32 65535, %v248_v58 }
 0x168   :  { %v350_v30 = vcvt.s32.f32 %v348_v22 }
 0x169   :  { %v337_v61 = vcvt.s32.f32 %v335_v59  ;;  %v336_v26 = vcvt.s32.f32 %v334_v17 }
 0x16b   :  { %324 = vmin.xlane.f32.xlu1 %v323_v60  ;;  %338 = vmin.xlane.f32.xlu0 %v337_v61 }
 0x16f   :  { %352 = vmin.xlane.f32.xlu1 %v351_v63 }
 0x1e6   :  { %v283_v3 = vpop.xlane.xlu0 %282 }
 0x1e7   :  { %vm284_vm1 = vcmp.eq.f32.partialorder %v281_v33, %v283_v3  ;;  %v289_v32 = vcvt.f32.s32 %v283_v3 }
 0x1e8   :  { %v285_v5 = vsel %vm284_vm1, %v280_v4, inf }
 0x1e9   :  { %286 = vmin.xlane.f32.xlu0 %v285_v5  ;;  %v290_v35 = vshll.u32 %v289_v32, 16 }
 0x1ea   :  { %v297_v7 = vpop.xlane.xlu1 %296  ;;  %v255_v8 = vpop.xlane.xlu0 %254 }
 0x1eb   :  { %vm298_vm2 = vcmp.eq.f32.partialorder %v295_v41, %v297_v7  ;;  %vm256_vm3 = vcmp.eq.f32.partialorder %v253_v42, %v255_v8  ;;  %v303_v33 = vcvt.f32.s32 %v297_v7  ;;  %v261_v36 = vcvt.f32.s32 %v255_v8 }
 0x1ec   :  { %v299_v12 = vsel %vm298_vm2, %v294_v9, inf  ;;  %v257_v13 = vsel %vm256_vm3, %v252_v10, inf }
 0x1ed   :  { %300 = vmin.xlane.f32.xlu1 %v299_v12  ;;  %258 = vmin.xlane.f32.xlu0 %v257_v13  ;;  %v304_v39 = vshll.u32 %v303_v33, 16  ;;  %v262_v42 = vshll.u32 %v261_v36, 16 }
 0x1ee   :  { %v311_v14 = vpop.xlane.xlu0 %310 }
 0x1ef   :  { %vm312_vm4 = vcmp.eq.f32.partialorder %v309_v50, %v311_v14  ;;  %v317_v43 = vcvt.f32.s32 %v311_v14 }
 0x1f0   :  { %v269_v18 = vpop.xlane.xlu1 %268  ;;  %v313_v19 = vsel %vm312_vm4, %v308_v15, inf }
 0x1f1   :  { %314 = vmin.xlane.f32.xlu0 %v313_v19  ;;  %vm270_vm5 = vcmp.eq.f32.partialorder %v267_v55, %v269_v18  ;;  %v275_v46 = vcvt.f32.s32 %v269_v18  ;;  %v318_v50 = vshll.u32 %v317_v43, 16 }
 0x1f2   :  { %v271_v21 = vsel %vm270_vm5, %v266_v20, inf }
 0x1f3   :  { %272 = vmin.xlane.f32.xlu1 %v271_v21  ;;  %v276_v54 = vshll.u32 %v275_v46, 16 }
 0x1f4   :  { %v325_v23 = vpop.xlane.xlu1 %324  ;;  %v339_v24 = vpop.xlane.xlu0 %338 }
 0x1f5   :  { %vm326_vm6 = vcmp.eq.f32.partialorder %v323_v60, %v325_v23  ;;  %vm340_vm7 = vcmp.eq.f32.partialorder %v337_v61, %v339_v24  ;;  %v331_v52 = vcvt.f32.s32 %v325_v23  ;;  %v345_v55 = vcvt.f32.s32 %v339_v24 }
 0x1f6   :  { %v327_v27 = vsel %vm326_vm6, %v322_v25, inf  ;;  %v341_v28 = vsel %vm340_vm7, %v336_v26, inf }
 0x1f7   :  { %328 = vmin.xlane.f32.xlu1 %v327_v27  ;;  %342 = vmin.xlane.f32.xlu0 %v341_v28  ;;  %v332_v59 = vshll.u32 %v331_v52, 16  ;;  %v346_v62 = vshll.u32 %v345_v55, 16 }
 0x1f8   :  { %v353_v29 = vpop.xlane.xlu1 %352 }
 0x1f9   :  { %vm354_vm8 = vcmp.eq.f32.partialorder %v351_v63, %v353_v29  ;;  %v359_v63 = vcvt.f32.s32 %v353_v29 }
 0x1fa   :  { %v355_v31 = vsel %vm354_vm8, %v350_v30, inf }
 0x1fb   :  { %356 = vmin.xlane.f32.xlu1 %v355_v31  ;;  %v360_v5 = vshll.u32 %v359_v63, 16 }
 0x272   :  { %v287_v34 = vpop.xlane.xlu0 %286 }
 0x273   :  { %v288_v37 = vcvt.f32.s32 %v287_v34 }
 0x275   :  { %v291_v38 = vadd.s32 %v290_v35, %v288_v37 }
 0x276   :  { %v301_v40 = vpop.xlane.xlu1 %300  ;;  %v259_v41 = vpop.xlane.xlu0 %258 }
 0x277   :  { %365 = vst.msk [vmem:[%s508_s2 + $0x10] sm:$0xff] %vm362_vm9, %v291_v38  ;;  %v302_v44 = vcvt.f32.s32 %v301_v40  ;;  %v260_v45 = vcvt.f32.s32 %v259_v41 }
 0x279   :  { %v305_v47 = vadd.s32 %v304_v39, %v302_v44  ;;  %v263_v48 = vadd.s32 %v262_v42, %v260_v45 }
 0x27a   :  { %v315_v49 = vpop.xlane.xlu0 %314 }
 0x27b   :  { %366 = vst.msk [vmem:[%s508_s2 + $0x18] sm:$0xff] %vm362_vm9, %v305_v47  ;;  %363 = vst.msk [vmem:[%s508_s2] sm:$0xff] %vm362_vm9, %v263_v48  ;;  %v316_v51 = vcvt.f32.s32 %v315_v49 }
 0x27c   :  { %v273_v53 = vpop.xlane.xlu1 %272 }
 0x27d   :  { %v319_v56 = vadd.s32 %v318_v50, %v316_v51  ;;  %v274_v57 = vcvt.f32.s32 %v273_v53 }
 0x27f   :  { %367 = vst.msk [vmem:[%s508_s2 + $0x20] sm:$0xff] %vm362_vm9, %v319_v56  ;;  %v277_v58 = vadd.s32 %v276_v54, %v274_v57 }
 0x280   :  { %v329_v60 = vpop.xlane.xlu1 %328  ;;  %v343_v61 = vpop.xlane.xlu0 %342 }
 0x281   :  { %364 = vst.msk [vmem:[%s508_s2 + $0x8] sm:$0xff] %vm362_vm9, %v277_v58  ;;  %v330_v0 = vcvt.f32.s32 %v329_v60  ;;  %v344_v1 = vcvt.f32.s32 %v343_v61 }
 0x283   :  { %v333_v2 = vadd.s32 %v332_v59, %v330_v0  ;;  %v347_v3 = vadd.s32 %v346_v62, %v344_v1 }
 0x284   :  { %v357_v4 = vpop.xlane.xlu1 %356 }
 0x285   :  { %368 = vst.msk [vmem:[%s508_s2 + $0x28] sm:$0xff] %vm362_vm9, %v333_v2  ;;  %369 = vst.msk [vmem:[%s508_s2 + $0x30] sm:$0xff] %vm362_vm9, %v347_v3  ;;  %v358_v6 = vcvt.f32.s32 %v357_v4 }
 0x287   :  { %v361_v7 = vadd.s32 %v360_v5, %v358_v6 }
 0x289   :  { %370 = vst.msk [vmem:[%s508_s2 + $0x38] sm:$0xff] %vm362_vm9, %v361_v7 }

// kernel: token_rank_forward.5
= control target key start
LH: loop header
LB: loop body
LE: loop exit
PB: predicated region body
PF: predicated region fallthrough
CT: control target
= control target key end

     0   :  { %vm81_vm0 = vcmask 31744   ;;  %v230_v3 = vmov 0.0   ;;  %s276_s0 = inlined_call_operand.vmem [shape: f32[4,32], index: 0, kind: input, shape index: {}]   ;;  %s277_s1 = inlined_call_operand.vmem [shape: f32[32,4], index: 1, kind: input, shape index: {}]   ;;  %s278_s2 = inlined_call_operand.hbm [shape: f32[1,1], index: 2, kind: output, shape index: {}]  }
   0x1   :  { %v16_v0 = vld [vmem:[%s277_s1 + $0x10] sm:$0xff]  ;;  %v17_v1 = vld [vmem:[%s277_s1 + $0x18] sm:$0xff]  ;;  %v14_v2 = vld [vmem:[%s277_s1] sm:$0xff]  ;;  %185 = vmatprep.subr.bf16.mxu0 %v230_v3 }
   0x2   :  { %v20_v4 = vpack.c.bf16 %v17_v1, %v16_v0  ;;  %v79_v5 = vmul.f32 %v16_v0, %v16_v0  ;;  %v15_v6 = vld [vmem:[%s277_s1 + $0x8] sm:$0xff]  ;;  %v77_v7 = vmul.f32 %v14_v2, %v14_v2 }
   0x3   :  { %7 = vsyncpa [#allocation3], 0  ;;  %v80_v8 = vmul.f32 %v17_v1, %v17_v1  ;;  %v78_v9 = vmul.f32 %v15_v6, %v15_v6  ;;  %vm231_vm1 = vmmov 0   ;;  %v13_v10 = vld [vmem:[%s276_s0] sm:$0xf]  ;;  %v19_v11 = vpack.c.bf16 %v15_v6, %v14_v2  ;;  %s232_s0 = smov [#allocation2]  }
   0x4   :  { %189 = vmatprep.mubr.msk.bf16.mxu0 %vm231_vm1, %v230_v3  ;;  %186 = vmatpush3.bf16.msra.mxu0 %v20_v4  ;;  %v82_v12 = vsel %vm81_vm0, %v77_v7, 0.0  ;;  %v65_v13 = vmul.f32 %v13_v10, %v13_v10  ;;  %v85_v14 = vsel %vm81_vm0, %v79_v5, 0.0  ;;  %vm66_vm2 = vcmask 257024   ;;  %s172_s1 = sshll.u32 %s232_s0, 4  ;;  %s173_s1 = int_to_ptr.vmem [resolvable:$true] %s172_s1 }
   0x5   :  { %187 = vmatprep.subr.bf16.mxu0 %v230_v3  ;;  %v83_v15 = vsel %vm81_vm0, %v78_v9, 0.0  ;;  %v87_v18 = vsel %vm81_vm0, %v80_v8, 0.0  ;;  %v18_v19 = vpack.c.bf16 %v13_v10, %v13_v10  ;;  %vm21_vm3 = vcmask 261120   ;;  %s208_s21 = scalar_lea.vmem %s173_s1, 16  ;;  %s212_s22 = scalar_lea.vmem %s173_s1, 32 }
   0x6   :  { %v84_v16 = vadd.f32 %v83_v15, %v82_v12  ;;  %v67_v17 = vsel %vm66_vm2, %v65_v13, 0.0  ;;  %v106_v22 = vlaneseq  ;;  %vm130_vm10 = vcmask 27648   ;;  %p209_p0 = scmp.ne.s32.totalorder %s173_s1, %s208_s21  ;;  %p213_p1 = scmp.lt.s32.totalorder %s173_s1, %s173_s1 }
   0x7   :  { %68 = vadd.xlane.f32.xlu0 %v67_v17  ;;  %vm149_vm11 = vcmask 3072   ;;  %vm164_vm12 = vcmask 0   ;;  %p214_p2 = scmp.lt.s32.totalorder %s212_s22, %s208_s21 }
   0x8   :  { %188 = vmatpush3.bf16.msra.mxu0 %v19_v11  ;;  %v86_v20 = vadd.f32 %v85_v14, %v84_v16  ;;  %v107_v23 = vshrl.u32 %v106_v22, 7  ;;  %v109_v27 = vand.u32 127, %v106_v22 }
   0x9   :  { %p215_p3 = por %p214_p2, %p213_p1 }
   0xa   :  { %v88_v21 = vadd.f32 %v87_v18, %v86_v20  ;;  %v120_v24 = vand.u32 1, %v107_v23  ;;  %v115_v25 = vadd.s32 1, %v107_v23  ;;  %vm110_vm9 = vcmp.eq.s32.totalorder %v107_v23, %v109_v27 }
   0xb   :  { %190 = vmatmul.mubr.msk.bf16.vlgmr.msra.gmra.mxu0 %vm21_vm3, %v18_v19  ;;  %p216_p4 = pnand %p215_p3, %p209_p0 }
   0xc   :  { %v128_v26 = vmul.u32 2, %v120_v24  ;;  %v89_v30 = vrot.slane %v88_v21, 4 }
   0xe   :  { %v129_v28 = vsub.s32 %v115_v25, %v128_v26  ;;  %v90_v31 = vadd.f32 %v89_v30, %v88_v21 }
  0x10   :  { %vm267_vm4 = vcmp.eq.s32.totalorder %v109_v27, %v129_v28  ;;  %v91_v32 = vrot.slane %v90_v31, 2 }
  0x12   :  { %v92_v33 = vadd.f32 %v91_v32, %v90_v31 }
  0x14   :  { %v93_v34 = vrot.slane %v92_v33, 1 }
  0x16   :  { %v94_v35 = vadd.f32 %v93_v34, %v92_v33 }
  0x18   :  { %198 = vrsqrt.f32 %v94_v35  ;;  %vm97_vm5 = vcmp.eq.f32.partialorder %v94_v35, inf  ;;  %v100_v41 = vand.u32 2147483648, %v94_v35  ;;  %vm99_vm7 = vcmp.eq.f32.partialorder %v94_v35, 0.0 }
  0x25   :  { %v199_v37 = vpop.eup %198 }
  0x26   :  { %v96_v39 = vmul.f32 %v199_v37, %v94_v35 }
  0x28   :  { %v98_v43 = vsel %vm97_vm5, %v94_v35, %v96_v39 }
  0x29   :  { %v101_v45 = vsel %vm99_vm7, %v100_v41, %v98_v43 }
  0x90   :  { %v69_v36 = vpop.xlane.xlu0 %68 }
  0x91   :  { %200 = vrsqrt.f32 %v69_v36  ;;  %vm72_vm6 = vcmp.eq.f32.partialorder %v69_v36, inf  ;;  %v75_v42 = vand.u32 2147483648, %v69_v36  ;;  %vm74_vm8 = vcmp.eq.f32.partialorder %v69_v36, 0.0 }
  0x9e   :  { %v201_v38 = vpop.eup %200 }
  0x9f   :  { %v71_v40 = vmul.f32 %v201_v38, %v69_v36 }
  0xa1   :  { %v73_v44 = vsel %vm72_vm6, %v69_v36, %v71_v40 }
  0xa2   :  { %v76_v46 = vsel %vm74_vm8, %v75_v42, %v73_v44 }
  0xa3   :  { %v102_v47 = vmul.f32 %v101_v45, %v76_v46 }
  0xa5   :  { %v103_v48 = vmax.f32 %v102_v47, 1e-08 }
  0xa7   :  { %202 = vrcp.f32 %v103_v48 }
  0xb4   :  { %v203_v49 = vpop.eup %202 }
  0xcb   :  { %v59_v50 = vpop.f32.mrf.mxu0 }
  0xcc   :  { %v105_v51 = vmul.f32 %v203_v49, %v59_v50 }
  0xcd   :  { %v191_v52 = vpop.f32.mrf.mxu0 }
  0xce   :  { %v181_v53 = vadd.f32 -1e+12, %v105_v51 }
  0xcf   :  { %v62_v54 = vpop.f32.mrf.mxu0 }
  0xd0   :  { %v112_v55 = vsel %vm110_vm9, %v181_v53, %v105_v51 }
  0xd1   :  { %v192_v56 = vpop.f32.mrf.mxu0  ;;  %v114_v57 = vmul.f32 20.0, %v112_v55 }
  0xd3   :  { %v131_v58 = vsel %vm130_vm10, %v114_v57, -inf  ;;  %v144_v0 = vsel %vm267_vm4, %v114_v57, 0.0 }
  0xd4   :  { %132 = vmax.xlane.f32.xlu0 %v131_v58  ;;  %v145_v1 = vsel %vm130_vm10, %v144_v0, 0.0 }
 0x15d   :  { %v133_v59 = vpop.xlane.xlu0 %132 }
 0x15e   :  { %v134_v60 = vsub.f32 %v114_v57, %v133_v59 }
 0x160   :  { %v135_v61 = vmul.f32 1.442695, %v134_v60 }
 0x162   :  { %204 = vpow2.f32 %v135_v61 }
 0x16f   :  { %v205_v62 = vpop.eup %204 }
 0x170   :  { %v137_v63 = vsel %vm130_vm10, %v205_v62, 0.0 }
 0x171   :  { %138 = vadd.xlane.f32.xlu1 %v137_v63 }
 0x175   :  { %146 = vadd.xlane.f32.xlu1 %v145_v1 }
 0x1fa   :  { %v139_v2 = vpop.xlane.xlu1 %138 }
 0x1fb   :  { %206 = vlog2.f32 %v139_v2 }
 0x1fe   :  { %v147_v6 = vpop.xlane.xlu1 %146 }
 0x208   :  { %v207_v3 = vpop.eup %206 }
 0x209   :  { %v141_v4 = vmul.f32 0.6931472, %v207_v3 }
 0x20b   :  { %v142_v5 = vadd.f32 %v141_v4, %v133_v59 }
 0x20d   :  { %v148_v7 = vsub.f32 %v142_v5, %v147_v6 }
 0x20f   :  { %v150_v8 = vsel %vm149_vm11, %v148_v7, 0.0 }
 0x210   :  { %151 = vadd.xlane.f32.xlu0 %v150_v8 }
 0x299   :  { %v152_v9 = vpop.xlane.xlu0 %151 }
 0x29a   :  { %v153_v10 = vrot.slane %v152_v9, 4 }
 0x29c   :  { %v154_v11 = vadd.f32 %v153_v10, %v152_v9 }
 0x29e   :  { %v155_v12 = vrot.slane %v154_v11, 2 }
 0x2a0   :  { %v156_v13 = vadd.f32 %v155_v12, %v154_v11 }
 0x2a2   :  { %v157_v14 = vrot.slane %v156_v13, 1 }
 0x2a4   :  { %v158_v15 = vadd.f32 %v157_v14, %v156_v13 }
 0x2a6   :  { %193 = vpush %v158_v15 }
 0x2d7   :  { %s194_s19 = spop %193 }
 0x2d8   :  { %s162_s20 = smul.f32 0.25, %s194_s19 }
 0x2da   :  { %v163_v16 = vstv %s162_s20 }
 0x2db   :  { %165 = vst.msk [vmem:[#allocation2] sm:$0x1] %vm164_vm12, %v163_v16 }
 0x2dc   :  { %219 = shalt.err (!%p216_p4)
}
 0x2dd   :  { %175 = dma.vmem_to_hbm [thread:$0]  %s173_s1, 16, %s278_s2, [#allocation3]  }
 0x2de   :  { %228 = dma.done.wait [#allocation3], 16  }
 0x2df   :  { %229 = vsyncadd [#allocation3], 4294967280 }
 0x2e0   :  { %179 = vsyncpa [#allocation3], 1 }

// kernel: token_rank_forward.4
= control target key start
LH: loop header
LB: loop body
LE: loop exit
PB: predicated region body
PF: predicated region fallthrough
CT: control target
= control target key end

     0   :  { %vm36_vm0 = vcmask 261120   ;;  %s1363_s0 = inlined_call_operand.vmem [shape: bf16[64,32], index: 0, kind: input, shape index: {}]   ;;  %s1364_s1 = inlined_call_operand.vmem [shape: bf16[64,128], index: 1, kind: input, shape index: {}]   ;;  %s1365_s2 = inlined_call_operand.hbm [shape: f32[1,1], index: 2, kind: output, shape index: {}]  }
   0x1   :  { %v779_v0 = vld [vmem:[%s1363_s0 + $0x8] sm:$0xff]   ;;  %v748_v1 = vld [vmem:[%s1363_s0] sm:$0xff]   ;;  %v780_v2 = vld [vmem:[%s1363_s0 + $0x10] sm:$0xff]  }
   0x2   :  { %v971_v3 = vunpack.c.l.bf16 %v779_v0  ;;  %v973_v4 = vunpack.c.l.bf16 %v748_v1  ;;  %v975_v5 = vunpack.c.h.bf16 %v779_v0  ;;  %v977_v6 = vunpack.c.h.bf16 %v748_v1 }
   0x3   :  { %v979_v7 = vunpack.c.h.bf16 %v780_v2  ;;  %v981_v8 = vunpack.c.l.bf16 %v780_v2 }
   0x4   :  { %7 = vsyncpa [#allocation3], 0  ;;  %v30_v9 = vmul.f32 %v971_v3, %v971_v3  ;;  %v28_v10 = vmul.f32 %v973_v4, %v973_v4  ;;  %v31_v11 = vmul.f32 %v975_v5, %v975_v5  ;;  %v29_v12 = vmul.f32 %v977_v6, %v977_v6  ;;  %v781_v13 = vld [vmem:[%s1363_s0 + $0x18] sm:$0xff]   ;;  %v764_v22 = vld [vmem:[%s1364_s1] sm:$0xff]   ;;  %s944_s24 = smov 64   ;;  %s945_s25 = smov 32  }
   0x5   :  { %v996_v16 = vunpack.c.h.bf16 %v781_v13  ;;  %v998_v17 = vunpack.c.l.bf16 %v781_v13  ;;  %v33_v20 = vmul.f32 %v979_v7, %v979_v7  ;;  %v32_v21 = vmul.f32 %v981_v8, %v981_v8  ;;  %v782_v29 = vld [vmem:[%s1364_s1 + $0x8] sm:$0xff]   ;;  %v783_v36 = vld [vmem:[%s1364_s1 + $0x10] sm:$0xff]   ;;  %v784_v43 = vld [vmem:[%s1364_s1 + $0x18] sm:$0xff]   ;;  %s943_s1 = smov 96   ;;  %s946_s3 = smov [#allocation2]  }
   0x6   :  { %v43_v14 = vsel %vm36_vm0, %v30_v9, 0.0  ;;  %v37_v15 = vsel %vm36_vm0, %v28_v10, 0.0  ;;  %v46_v18 = vsel %vm36_vm0, %v31_v11, 0.0  ;;  %v40_v19 = vsel %vm36_vm0, %v29_v12, 0.0  ;;  %s739_s4 = sshll.u32 %s946_s3, 4  ;;  %s740_s4 = int_to_ptr.vmem [resolvable:$true] %s739_s4 }
   0x7   :  { %44 = vadd.xlane.f32.xlu1 %v43_v14  ;;  %38 = vadd.xlane.f32.xlu0 %v37_v15  ;;  %v35_v23 = vmul.f32 %v996_v16, %v996_v16  ;;  %v34_v24 = vmul.f32 %v998_v17, %v998_v17  ;;  %v52_v25 = vsel %vm36_vm0, %v33_v20, 0.0  ;;  %v49_v26 = vsel %vm36_vm0, %v32_v21, 0.0  ;;  %s921_s7 = scalar_lea.vmem %s740_s4, 16  ;;  %s925_s8 = scalar_lea.vmem %s740_s4, 32 }
   0x8   :  { %v1015_v27 = vunpack.c.h.bf16 %v764_v22  ;;  %v1017_v28 = vunpack.c.l.bf16 %v764_v22  ;;  %v770_v34 = vunpack.c.h.bf16 %v782_v29  ;;  %v769_v35 = vunpack.c.l.bf16 %v782_v29  ;;  %p922_p0 = scmp.ne.s32.totalorder %s740_s4, %s921_s7  ;;  %p926_p1 = scmp.lt.s32.totalorder %s740_s4, %s740_s4 }
   0x9   :  { %v58_v30 = vsel %vm36_vm0, %v35_v23, 0.0  ;;  %v55_v31 = vsel %vm36_vm0, %v34_v24, 0.0  ;;  %v774_v37 = vunpack.c.h.bf16 %v783_v36  ;;  %v773_v38 = vunpack.c.l.bf16 %v783_v36  ;;  %p927_p2 = scmp.lt.s32.totalorder %s925_s8, %s921_s7 }
   0xa   :  { %v78_v32 = vmul.f32 %v1015_v27, %v977_v6  ;;  %v77_v33 = vmul.f32 %v1017_v28, %v973_v4  ;;  %v80_v41 = vmul.f32 %v770_v34, %v975_v5  ;;  %v79_v42 = vmul.f32 %v769_v35, %v971_v3 }
   0xb   :  { %47 = vadd.xlane.f32.xlu1 %v46_v18  ;;  %41 = vadd.xlane.f32.xlu0 %v40_v19  ;;  %v778_v44 = vunpack.c.h.bf16 %v784_v43  ;;  %v777_v45 = vunpack.c.l.bf16 %v784_v43  ;;  %v82_v48 = vmul.f32 %v774_v37, %v979_v7  ;;  %v81_v49 = vmul.f32 %v773_v38, %v981_v8  ;;  %p928_p3 = por %p927_p2, %p926_p1 }
   0xc   :  { %v88_v39 = vsel %vm36_vm0, %v78_v32, 0.0  ;;  %v85_v40 = vsel %vm36_vm0, %v77_v33, 0.0  ;;  %v94_v46 = vsel %vm36_vm0, %v80_v41, 0.0  ;;  %v91_v47 = vsel %vm36_vm0, %v79_v42, 0.0 }
   0xd   :  { %v100_v50 = vsel %vm36_vm0, %v82_v48, 0.0  ;;  %v97_v51 = vsel %vm36_vm0, %v81_v49, 0.0  ;;  %v84_v52 = vmul.f32 %v778_v44, %v996_v16  ;;  %v83_v53 = vmul.f32 %v777_v45, %v998_v17  ;;  %p929_p4 = pnand %p928_p3, %p922_p0 }
   0xe   :  { %v110_v56 = vmul.f32 %v1015_v27, %v1015_v27  ;;  %v109_v57 = vmul.f32 %v1017_v28, %v1017_v28  ;;  %v112_v60 = vmul.f32 %v770_v34, %v770_v34  ;;  %v111_v61 = vmul.f32 %v769_v35, %v769_v35 }
   0xf   :  { %53 = vadd.xlane.f32.xlu1 %v52_v25  ;;  %50 = vadd.xlane.f32.xlu0 %v49_v26  ;;  %v106_v54 = vsel %vm36_vm0, %v84_v52, 0.0  ;;  %v103_v55 = vsel %vm36_vm0, %v83_v53, 0.0  ;;  %v114_v0 = vmul.f32 %v774_v37, %v774_v37  ;;  %v1056_v1 = vmul.f32 %v773_v38, %v773_v38 }
  0x10   :  { %v120_v58 = vsel %vm36_vm0, %v110_v56, 0.0  ;;  %v117_v59 = vsel %vm36_vm0, %v109_v57, 0.0  ;;  %v126_v62 = vsel %vm36_vm0, %v112_v60, 0.0  ;;  %v123_v63 = vsel %vm36_vm0, %v111_v61, 0.0 }
  0x11   :  { %v132_v2 = vsel %vm36_vm0, %v114_v0, 0.0  ;;  %v129_v9 = vsel %vm36_vm0, %v1056_v1, 0.0  ;;  %v1061_v10 = vmul.f32 %v778_v44, %v778_v44  ;;  %v1063_v11 = vmul.f32 %v777_v45, %v777_v45 }
  0x12   :  { %v1071_v14 = vpack.i.bf16 %v1015_v27, %v1017_v28  ;;  %v1075_v15 = vpack.i.bf16 %v774_v37, %v773_v38  ;;  %v1077_v18 = vpack.i.bf16 %v770_v34, %v769_v35  ;;  %v1081_v19 = vpack.i.bf16 %v778_v44, %v777_v45 }
  0x13   :  { %59 = vadd.xlane.f32.xlu1 %v58_v30  ;;  %56 = vadd.xlane.f32.xlu0 %v55_v31  ;;  %v138_v12 = vsel %vm36_vm0, %v1061_v10, 0.0  ;;  %v135_v13 = vsel %vm36_vm0, %v1063_v11, 0.0  ;;  %vm181_vm1 = vcmask 7168   ;;  %vm731_vm2 = vcmask 0  }
  0x17   :  { %89 = vadd.xlane.f32.xlu1 %v88_v39  ;;  %86 = vadd.xlane.f32.xlu0 %v85_v40 }
  0x1b   :  { %95 = vadd.xlane.f32.xlu1 %v94_v46  ;;  %92 = vadd.xlane.f32.xlu0 %v91_v47 }
  0x1f   :  { %101 = vadd.xlane.f32.xlu1 %v100_v50  ;;  %98 = vadd.xlane.f32.xlu0 %v97_v51 }
  0x23   :  { %107 = vadd.xlane.f32.xlu1 %v106_v54  ;;  %104 = vadd.xlane.f32.xlu0 %v103_v55 }
  0x27   :  { %121 = vadd.xlane.f32.xlu1 %v120_v58  ;;  %118 = vadd.xlane.f32.xlu0 %v117_v59 }
  0x2b   :  { %127 = vadd.xlane.f32.xlu1 %v126_v62  ;;  %124 = vadd.xlane.f32.xlu0 %v123_v63 }
  0x2f   :  { %133 = vadd.xlane.f32.xlu1 %v132_v2  ;;  %130 = vadd.xlane.f32.xlu0 %v129_v9 }
  0x33   :  { %139 = vadd.xlane.f32.xlu1 %v138_v12  ;;  %136 = vadd.xlane.f32.xlu0 %v135_v13 }
  0x44   :  { %798 = vrot.lane.b32.xlu1 %v1071_v14, %s943_s1 }
  0x48   :  { %808 = vrot.lane.b32.xlu1 %v1075_v15, %s943_s1 }
  0x49   :  { %803 = vrot.lane.b32.xlu0 %v1077_v18, %s943_s1 }
  0x4c   :  { %813 = vrot.lane.b32.xlu1 %v1081_v19, %s943_s1 }
  0x4d   :  { %279 = vrot.lane.b32.xlu0 %v109_v57, %s943_s1 }
  0x51   :  { %281 = vrot.lane.b32.xlu0 %v110_v56, %s943_s1 }
  0x55   :  { %283 = vrot.lane.b32.xlu0 %v111_v61, %s943_s1 }
  0x59   :  { %448 = vrot.lane.b32.xlu0 %v109_v57, %s944_s24 }
  0x5d   :  { %450 = vrot.lane.b32.xlu0 %v110_v56, %s944_s24 }
  0x61   :  { %285 = vrot.lane.b32.xlu0 %v112_v60, %s943_s1 }
  0x65   :  { %452 = vrot.lane.b32.xlu0 %v111_v61, %s944_s24 }
  0x69   :  { %617 = vrot.lane.b32.xlu0 %v109_v57, %s945_s25 }
  0x6d   :  { %619 = vrot.lane.b32.xlu0 %v110_v56, %s945_s25 }
  0x71   :  { %454 = vrot.lane.b32.xlu0 %v112_v60, %s944_s24 }
  0x75   :  { %621 = vrot.lane.b32.xlu0 %v111_v61, %s945_s25 }
  0x79   :  { %289 = vrot.lane.b32.xlu0 %v114_v0, %s943_s1 }
  0x7d   :  { %456 = vrot.lane.b32.xlu0 %v1056_v1, %s944_s24 }
  0x81   :  { %623 = vrot.lane.b32.xlu0 %v112_v60, %s945_s25 }
  0x85   :  { %458 = vrot.lane.b32.xlu0 %v114_v0, %s944_s24 }
  0x89   :  { %293 = vrot.lane.b32.xlu0 %v1061_v10, %s943_s1 }
  0x8d   :  { %627 = vrot.lane.b32.xlu0 %v114_v0, %s945_s25 }
  0x90   :  { %v1106_v20 = vpop.xlane.xlu1 %44  ;;  %v1108_v21 = vpop.xlane.xlu0 %38 }
  0x91   :  { %629 = vrot.lane.b32.xlu0 %v1063_v11, %s945_s25 }
  0x94   :  { %v1112_v22 = vpop.xlane.xlu1 %47  ;;  %v1114_v23 = vpop.xlane.xlu0 %41 }
  0x95   :  { %631 = vrot.lane.b32.xlu0 %v1061_v10, %s945_s25 }
  0x98   :  { %v1118_v24 = vpop.xlane.xlu1 %53  ;;  %v1120_v25 = vpop.xlane.xlu0 %50 }
  0x99   :  { %828 = vrot.lane.b32.xlu0 %v1071_v14, %s945_s25 }
  0x9c   :  { %v1124_v26 = vpop.xlane.xlu1 %59  ;;  %v1126_v27 = vpop.xlane.xlu0 %56 }
  0x9d   :  { %838 = vrot.lane.b32.xlu0 %v1075_v15, %s944_s24 }
  0xa0   :  { %v90_v28 = vpop.xlane.xlu1 %89  ;;  %v87_v29 = vpop.xlane.xlu0 %86 }
  0xa1   :  { %848 = vrot.lane.b32.xlu0 %v1081_v19, %s944_s24  ;;  %v141_v60 = vmul.f32 %v87_v29, %v87_v29  ;;  %v142_v63 = vmul.f32 %v90_v28, %v90_v28 }
  0xa4   :  { %v96_v30 = vpop.xlane.xlu1 %95  ;;  %v93_v31 = vpop.xlane.xlu0 %92 }
  0xa8   :  { %v102_v32 = vpop.xlane.xlu1 %101  ;;  %v99_v33 = vpop.xlane.xlu0 %98 }
  0xac   :  { %v1132_v34 = vpop.xlane.xlu1 %107  ;;  %v1134_v35 = vpop.xlane.xlu0 %104 }
  0xb0   :  { %v122_v36 = vpop.xlane.xlu1 %121  ;;  %v119_v37 = vpop.xlane.xlu0 %118 }
  0xb1   :  { %v150_v38 = vmul.f32 %v122_v36, %v1114_v23  ;;  %v149_v39 = vmul.f32 %v119_v37, %v1108_v21  ;;  %v143_v36 = vmul.f32 %v93_v31, %v93_v31 }
  0xb3   :  { %v158_v40 = vmax.f32 %v150_v38, 1e-12  ;;  %v157_v41 = vmax.f32 %v149_v39, 1e-12 }
  0xb4   :  { %v128_v42 = vpop.xlane.xlu1 %127  ;;  %v125_v43 = vpop.xlane.xlu0 %124 }
  0xb5   :  { %857 = vrcp.f32 %v158_v40  ;;  %v152_v44 = vmul.f32 %v128_v42, %v1112_v22  ;;  %v151_v45 = vmul.f32 %v125_v43, %v1106_v20  ;;  %v144_v40 = vmul.f32 %v96_v30, %v96_v30 }
  0xb6   :  { %859 = vrcp.f32 %v157_v41  ;;  %v145_v43 = vmul.f32 %v99_v33, %v99_v33  ;;  %v147_v30 = vmul.f32 %v1134_v35, %v1134_v35 }
  0xb7   :  { %v160_v46 = vmax.f32 %v152_v44, 1e-12  ;;  %v159_v47 = vmax.f32 %v151_v45, 1e-12 }
  0xb8   :  { %v134_v48 = vpop.xlane.xlu1 %133  ;;  %v131_v49 = vpop.xlane.xlu0 %130 }
  0xb9   :  { %861 = vrcp.f32 %v160_v46  ;;  %v154_v50 = vmul.f32 %v134_v48, %v1118_v24  ;;  %v153_v51 = vmul.f32 %v131_v49, %v1120_v25  ;;  %v146_v49 = vmul.f32 %v102_v32, %v102_v32 }
  0xba   :  { %863 = vrcp.f32 %v159_v47 }
  0xbb   :  { %v162_v52 = vmax.f32 %v154_v50, 1e-12  ;;  %v161_v53 = vmax.f32 %v153_v51, 1e-12 }
  0xbc   :  { %v140_v54 = vpop.xlane.xlu1 %139  ;;  %v137_v55 = vpop.xlane.xlu0 %136 }
  0xbd   :  { %865 = vrcp.f32 %v162_v52  ;;  %v156_v56 = vmul.f32 %v140_v54, %v1124_v26  ;;  %v155_v57 = vmul.f32 %v137_v55, %v1126_v27 }
  0xbe   :  { %867 = vrcp.f32 %v161_v53 }
  0xbf   :  { %v164_v58 = vmax.f32 %v156_v56, 1e-12  ;;  %v163_v59 = vmax.f32 %v155_v57, 1e-12  ;;  %v148_v57 = vmul.f32 %v1132_v34, %v1132_v34 }
  0xc0   :  { %v1144_v61 = vpop.permute.xlu1 %798  ;;  %v1146_v62 = vpop.permute.xlu0 %803 }
  0xc1   :  { %869 = vrcp.f32 %v164_v58  ;;  %v800_v0 = vunpack.i.l.bf16 %v1144_v61 }
  0xc2   :  { %v858_v2 = vpop.eup %857  ;;  %871 = vrcp.f32 %v163_v59 }
  0xc3   :  { %v860_v9 = vpop.eup %859  ;;  %v168_v12 = vmul.f32 %v858_v2, %v142_v63  ;;  %v239_v13 = vmul.f32 %v800_v0, %v973_v4 }
  0xc4   :  { %v280_v37 = vpop.permute.xlu0 %279  ;;  %v166_v38 = vmul.f32 %v860_v9, %v141_v60 }
  0xc5   :  { %v247_v29 = vsel %vm36_vm0, %v239_v13, 0.0  ;;  %v183_v41 = vsel %vm181_vm1, %v168_v12, 0.0  ;;  %v303_v34 = vsel %vm36_vm0, %v280_v37, 0.0 }
  0xc6   :  { %v862_v39 = vpop.eup %861  ;;  %248 = vadd.xlane.f32.xlu1 %v247_v29  ;;  %v182_v28 = vsel %vm181_vm1, %v166_v38, 0.0 }
  0xc7   :  { %v864_v42 = vpop.eup %863  ;;  %v172_v46 = vmul.f32 %v862_v39, %v144_v40  ;;  %v184_v47 = vadd.f32 %v183_v41, %v182_v28 }
  0xc8   :  { %v282_v44 = vpop.permute.xlu0 %281  ;;  %v170_v45 = vmul.f32 %v864_v42, %v143_v36 }
  0xc9   :  { %v187_v55 = vsel %vm181_vm1, %v172_v46, 0.0 }
  0xca   :  { %v866_v48 = vpop.eup %865  ;;  %v185_v31 = vsel %vm181_vm1, %v170_v45, 0.0  ;;  %v306_v45 = vsel %vm36_vm0, %v282_v44, 0.0 }
  0xcb   :  { %v868_v50 = vpop.eup %867  ;;  %v186_v51 = vadd.f32 %v185_v31, %v184_v47  ;;  %v176_v54 = vmul.f32 %v866_v48, %v146_v49 }
  0xcc   :  { %v284_v52 = vpop.permute.xlu0 %283  ;;  %v174_v53 = vmul.f32 %v868_v50, %v145_v43 }
  0xcd   :  { %v188_v56 = vadd.f32 %v187_v55, %v186_v51  ;;  %v191_v0 = vsel %vm181_vm1, %v176_v54, 0.0  ;;  %v309_v39 = vsel %vm36_vm0, %v284_v52, 0.0  ;;  %v1199_v55 = vpop.permute.xlu1 %808 }
  0xce   :  { %v870_v33 = vpop.eup %869  ;;  %v189_v58 = vsel %vm181_vm1, %v174_v53, 0.0 }
  0xcf   :  { %v872_v32 = vpop.eup %871  ;;  %v190_v59 = vadd.f32 %v189_v58, %v188_v56  ;;  %v180_v63 = vmul.f32 %v870_v33, %v148_v57 }
  0xd0   :  { %v178_v60 = vmul.f32 %v872_v32, %v147_v30  ;;  %v449_v2 = vpop.permute.xlu0 %448 }
  0xd1   :  { %v192_v35 = vadd.f32 %v191_v0, %v190_v59  ;;  %v195_v13 = vsel %vm181_vm1, %v180_v63, 0.0  ;;  %v472_v28 = vsel %vm36_vm0, %v449_v2, 0.0  ;;  %v1202_v57 = vpop.permute.xlu1 %813 }
  0xd2   :  { %v193_v9 = vsel %vm181_vm1, %v178_v60, 0.0 }
  0xd3   :  { %v194_v12 = vadd.f32 %v193_v9, %v192_v35 }
  0xd4   :  { %v451_v36 = vpop.permute.xlu0 %450 }
  0xd5   :  { %v196_v38 = vadd.f32 %v195_v13, %v194_v12 }
  0xd7   :  { %197 = vadd.xlane.f32.xlu0 %v196_v38  ;;  %287 = vrot.lane.b32.xlu1 %v1056_v1, %s943_s1 }
  0xd8   :  { %v286_v29 = vpop.permute.xlu0 %285 }
  0xd9   :  { %v312_v37 = vsel %vm36_vm0, %v286_v29, 0.0 }
  0xdb   :  { %304 = vadd.xlane.f32.xlu0 %v303_v34  ;;  %291 = vrot.lane.b32.xlu1 %v1063_v11, %s943_s1 }
  0xdc   :  { %v453_v40 = vpop.permute.xlu0 %452 }
  0xdd   :  { %v478_v47 = vsel %vm36_vm0, %v453_v40, 0.0 }
  0xdf   :  { %310 = vadd.xlane.f32.xlu0 %v309_v39  ;;  %625 = vrot.lane.b32.xlu1 %v1056_v1, %s945_s25 }
  0xe0   :  { %v618_v41 = vpop.permute.xlu0 %617 }
  0xe1   :  { %v641_v42 = vsel %vm36_vm0, %v618_v41, 0.0 }
  0xe3   :  { %473 = vadd.xlane.f32.xlu0 %v472_v28  ;;  %460 = vrot.lane.b32.xlu1 %v1063_v11, %s944_s24 }
  0xe4   :  { %v620_v1 = vpop.permute.xlu0 %619 }
  0xe7   :  { %313 = vadd.xlane.f32.xlu0 %v312_v37  ;;  %462 = vrot.lane.b32.xlu1 %v1061_v10, %s944_s24 }
  0xe8   :  { %v455_v10 = vpop.permute.xlu0 %454 }
  0xeb   :  { %642 = vadd.xlane.f32.xlu0 %v641_v42  ;;  %818 = vrot.lane.b32.xlu1 %v1071_v14, %s944_s24  ;;  %v475_v14 = vsel %vm36_vm0, %v451_v36, 0.0 }
  0xec   :  { %v622_v11 = vpop.permute.xlu0 %621 }
  0xed   :  { %v647_v2 = vsel %vm36_vm0, %v622_v11, 0.0 }
  0xef   :  { %823 = vrot.lane.b32.xlu1 %v1077_v18, %s944_s24 }
  0xf0   :  { %v290_v43 = vpop.permute.xlu0 %289 }
  0xf1   :  { %v318_v49 = vsel %vm36_vm0, %v290_v43, 0.0 }
  0xf3   :  { %833 = vrot.lane.b32.xlu1 %v1077_v18, %s945_s25 }
  0xf4   :  { %v457_v46 = vpop.permute.xlu0 %456 }
  0xf5   :  { %v484_v12 = vsel %vm36_vm0, %v457_v46, 0.0 }
  0xf7   :  { %843 = vrot.lane.b32.xlu1 %v1075_v15, %s945_s25  ;;  %v644_v15 = vsel %vm36_vm0, %v620_v1, 0.0  ;;  %v801_v1 = vunpack.i.h.bf16 %v1144_v61 }
  0xf8   :  { %v624_v18 = vpop.permute.xlu0 %623 }
  0xf9   :  { %v650_v31 = vsel %vm36_vm0, %v624_v18, 0.0 }
  0xfb   :  { %853 = vrot.lane.b32.xlu1 %v1081_v19, %s945_s25  ;;  %v481_v19 = vsel %vm36_vm0, %v455_v10, 0.0  ;;  %v806_v10 = vunpack.i.h.bf16 %v1146_v62 }
  0xfc   :  { %v459_v48 = vpop.permute.xlu0 %458 }
  0xfd   :  { %v487_v50 = vsel %vm36_vm0, %v459_v48, 0.0  ;;  %v240_v48 = vmul.f32 %v801_v1, %v977_v6  ;;  %v242_v61 = vmul.f32 %v806_v10, %v975_v5 }
 0x100   :  { %v294_v44 = vpop.permute.xlu0 %293 }
 0x101   :  { %v324_v30 = vsel %vm36_vm0, %v294_v44, 0.0 }
 0x104   :  { %v628_v51 = vpop.permute.xlu0 %627 }
 0x105   :  { %v656_v53 = vsel %vm36_vm0, %v628_v51, 0.0 }
 0x108   :  { %v630_v52 = vpop.permute.xlu0 %629 }
 0x109   :  { %v659_v54 = vsel %vm36_vm0, %v630_v52, 0.0 }
 0x10c   :  { %v632_v56 = vpop.permute.xlu0 %631 }
 0x10d   :  { %v662_v33 = vsel %vm36_vm0, %v632_v56, 0.0 }
 0x110   :  { %v1204_v58 = vpop.permute.xlu0 %828 }
 0x114   :  { %v1209_v63 = vpop.permute.xlu0 %838 }
 0x118   :  { %v1212_v35 = vpop.permute.xlu0 %848 }
 0x119   :  { %v850_v1 = vunpack.i.l.bf16 %v1212_v35 }
 0x11f   :  { %307 = vadd.xlane.f32.xlu1 %v306_v45  ;;  %v830_v45 = vunpack.i.l.bf16 %v1204_v58 }
 0x123   :  { %476 = vadd.xlane.f32.xlu1 %v475_v14 }
 0x127   :  { %479 = vadd.xlane.f32.xlu1 %v478_v47  ;;  %v805_v47 = vunpack.i.l.bf16 %v1146_v62  ;;  %v250_v62 = vsel %vm36_vm0, %v240_v48, 0.0 }
 0x129   :  { %v241_v44 = vmul.f32 %v805_v47, %v971_v3 }
 0x12b   :  { %645 = vadd.xlane.f32.xlu1 %v644_v15  ;;  %v253_v56 = vsel %vm36_vm0, %v241_v44, 0.0 }
 0x12f   :  { %482 = vadd.xlane.f32.xlu1 %v481_v19 }
 0x133   :  { %319 = vadd.xlane.f32.xlu1 %v318_v49  ;;  %v585_v49 = vmul.f32 %v830_v45, %v973_v4 }
 0x137   :  { %651 = vadd.xlane.f32.xlu1 %v650_v31 }
 0x13b   :  { %488 = vadd.xlane.f32.xlu1 %v487_v50  ;;  %v810_v50 = vunpack.i.l.bf16 %v1199_v55 }
 0x13f   :  { %325 = vadd.xlane.f32.xlu1 %v324_v30  ;;  %v256_v30 = vsel %vm36_vm0, %v242_v61, 0.0 }
 0x143   :  { %657 = vadd.xlane.f32.xlu1 %v656_v53  ;;  %v593_v53 = vsel %vm36_vm0, %v585_v49, 0.0 }
 0x147   :  { %660 = vadd.xlane.f32.xlu1 %v659_v54 }
 0x14b   :  { %663 = vadd.xlane.f32.xlu1 %v662_v33 }
 0x14f   :  { %v1206_v32 = vpop.xlane.xlu1 %248 }
 0x153   :  { %v288_v59 = vpop.permute.xlu1 %287 }
 0x154   :  { %v315_v60 = vsel %vm36_vm0, %v288_v59, 0.0  ;;  %v840_v59 = vunpack.i.l.bf16 %v1209_v63 }
 0x155   :  { %316 = vadd.xlane.f32.xlu0 %v315_v60 }
 0x157   :  { %v292_v0 = vpop.permute.xlu1 %291 }
 0x158   :  { %v321_v13 = vsel %vm36_vm0, %v292_v0, 0.0 }
 0x159   :  { %648 = vadd.xlane.f32.xlu0 %v647_v2  ;;  %v831_v2 = vunpack.i.h.bf16 %v1204_v58 }
 0x15b   :  { %v626_v9 = vpop.permute.xlu1 %625 }
 0x15c   :  { %v653_v29 = vsel %vm36_vm0, %v626_v9, 0.0 }
 0x15d   :  { %485 = vadd.xlane.f32.xlu0 %v484_v12 }
 0x15f   :  { %v461_v36 = vpop.permute.xlu1 %460 }
 0x160   :  { %v198_v38 = vpop.xlane.xlu0 %197  ;;  %v490_v37 = vsel %vm36_vm0, %v461_v36, 0.0 }
 0x161   :  { %v199_v34 = vrot.slane %v198_v38, 4  ;;  %322 = vadd.xlane.f32.xlu0 %v321_v13 }
 0x163   :  { %v200_v39 = vadd.f32 %v199_v34, %v198_v38  ;;  %v463_v40 = vpop.permute.xlu1 %462  ;;  %v420_v38 = vmul.f32 %v840_v59, %v981_v8 }
 0x164   :  { %v493_v14 = vsel %vm36_vm0, %v463_v40, 0.0  ;;  %v305_v59 = vpop.xlane.xlu0 %304 }
 0x165   :  { %v201_v28 = vrot.slane %v200_v39, 2  ;;  %654 = vadd.xlane.f32.xlu0 %v653_v29  ;;  %v815_v29 = vunpack.i.l.bf16 %v1202_v57  ;;  %v436_v58 = vsel %vm36_vm0, %v420_v38, 0.0 }
 0x167   :  { %v819_v41 = vpop.permute.xlu1 %818  ;;  %v202_v42 = vadd.f32 %v201_v28, %v200_v39  ;;  %v811_v28 = vunpack.i.h.bf16 %v1199_v55  ;;  %v851_v55 = vunpack.i.h.bf16 %v1212_v35  ;;  %v816_v35 = vunpack.i.h.bf16 %v1202_v57 }
 0x168   :  { %v820_v11 = vunpack.i.l.bf16 %v819_v41  ;;  %v821_v51 = vunpack.i.h.bf16 %v819_v41  ;;  %v245_v41 = vmul.f32 %v815_v29, %v998_v17 }
 0x169   :  { %491 = vadd.xlane.f32.xlu0 %v490_v37  ;;  %v203_v43 = vrot.slane %v202_v42, 1  ;;  %v244_v45 = vmul.f32 %v811_v28, %v979_v7  ;;  %v423_v61 = vmul.f32 %v851_v55, %v996_v16 }
 0x16a   :  { %v416_v46 = vmul.f32 %v820_v11, %v973_v4  ;;  %v243_v4 = vmul.f32 %v810_v50, %v981_v8  ;;  %v417_v33 = vmul.f32 %v821_v51, %v977_v6  ;;  %v265_v11 = vsel %vm36_vm0, %v245_v41, 0.0 }
 0x16b   :  { %v204_v18 = vadd.f32 %v203_v43, %v202_v42  ;;  %v824_v15 = vpop.permute.xlu1 %823  ;;  %v246_v51 = vmul.f32 %v816_v35, %v996_v16 }
 0x16c   :  { %v424_v19 = vsel %vm36_vm0, %v416_v46, 0.0  ;;  %v825_v52 = vunpack.i.l.bf16 %v824_v15  ;;  %v259_v9 = vsel %vm36_vm0, %v243_v4, 0.0  ;;  %v427_v12 = vsel %vm36_vm0, %v417_v33, 0.0 }
 0x16d   :  { %785 = vpush %v204_v18  ;;  %494 = vadd.xlane.f32.xlu0 %v493_v14  ;;  %425 = vadd.xlane.f32.xlu1 %v424_v19  ;;  %v826_v39 = vunpack.i.h.bf16 %v824_v15  ;;  %v422_v46 = vmul.f32 %v850_v1, %v998_v17  ;;  %v841_v18 = vunpack.i.h.bf16 %v1209_v63  ;;  %v445_v63 = vsel %vm36_vm0, %v423_v61, 0.0 }
 0x16e   :  { %v418_v0 = vmul.f32 %v825_v52, %v971_v3 }
 0x16f   :  { %v834_v31 = vpop.permute.xlu1 %833  ;;  %v419_v42 = vmul.f32 %v826_v39, %v975_v5  ;;  %v442_v19 = vsel %vm36_vm0, %v422_v46, 0.0  ;;  %v421_v44 = vmul.f32 %v841_v18, %v979_v7 }
 0x170   :  { %v835_v54 = vunpack.i.l.bf16 %v834_v31  ;;  %v430_v36 = vsel %vm36_vm0, %v418_v0, 0.0  ;;  %v311_v0 = vpop.xlane.xlu0 %310 }
 0x171   :  { %251 = vadd.xlane.f32.xlu0 %v250_v62  ;;  %257 = vadd.xlane.f32.xlu1 %v256_v30  ;;  %v433_v43 = vsel %vm36_vm0, %v419_v42, 0.0  ;;  %v439_v50 = vsel %vm36_vm0, %v421_v44, 0.0  ;;  %v268_v30 = vsel %vm36_vm0, %v246_v51, 0.0 }
 0x172   :  { %v587_v60 = vmul.f32 %v835_v54, %v971_v3  ;;  %v586_v3 = vmul.f32 %v831_v2, %v977_v6  ;;  %v836_v6 = vunpack.i.h.bf16 %v834_v31 }
 0x173   :  { %v844_v34 = vpop.permute.xlu1 %843 }
 0x174   :  { %v599_v13 = vsel %vm36_vm0, %v587_v60, 0.0  ;;  %v845_v40 = vunpack.i.l.bf16 %v844_v34  ;;  %v596_v37 = vsel %vm36_vm0, %v586_v3, 0.0  ;;  %v588_v15 = vmul.f32 %v836_v6, %v975_v5 }
 0x175   :  { %594 = vadd.xlane.f32.xlu1 %v593_v53  ;;  %254 = vadd.xlane.f32.xlu0 %v253_v56  ;;  %v846_v5 = vunpack.i.h.bf16 %v844_v34  ;;  %v337_v6 = vmul.f32 %v311_v0, %v1106_v20 }
 0x176   :  { %v589_v10 = vmul.f32 %v845_v40, %v981_v8  ;;  %v262_v8 = vsel %vm36_vm0, %v244_v45, 0.0  ;;  %v602_v49 = vsel %vm36_vm0, %v588_v15, 0.0 }
 0x177   :  { %v854_v47 = vpop.permute.xlu1 %853  ;;  %v590_v52 = vmul.f32 %v846_v5, %v979_v7 }
 0x178   :  { %v605_v14 = vsel %vm36_vm0, %v589_v10, 0.0  ;;  %v856_v48 = vunpack.i.h.bf16 %v854_v47  ;;  %v855_v57 = vunpack.i.l.bf16 %v854_v47  ;;  %v345_v47 = vmax.f32 %v337_v6, 1e-12 }
 0x179   :  { %260 = vadd.xlane.f32.xlu1 %v259_v9  ;;  %428 = vadd.xlane.f32.xlu0 %v427_v12  ;;  %v608_v53 = vsel %vm36_vm0, %v590_v52, 0.0  ;;  %v474_v9 = vpop.xlane.xlu0 %473 }
 0x17a   :  { %v592_v31 = vmul.f32 %v856_v48, %v996_v16  ;;  %v591_v54 = vmul.f32 %v855_v57, %v998_v17  ;;  %v504_v45 = vmul.f32 %v474_v9, %v1108_v21 }
 0x17c   :  { %v614_v62 = vsel %vm36_vm0, %v592_v31, 0.0  ;;  %v611_v56 = vsel %vm36_vm0, %v591_v54, 0.0 }
 0x17d   :  { %600 = vadd.xlane.f32.xlu1 %v599_v13  ;;  %431 = vadd.xlane.f32.xlu0 %v430_v36  ;;  %v314_v7 = vpop.xlane.xlu0 %313 }
 0x17e   :  { %v338_v55 = vmul.f32 %v314_v7, %v1112_v22 }
 0x180   :  { %v346_v61 = vmax.f32 %v338_v55, 1e-12 }
 0x181   :  { %437 = vadd.xlane.f32.xlu1 %v436_v58  ;;  %597 = vadd.xlane.f32.xlu0 %v596_v37  ;;  %v643_v36 = vpop.xlane.xlu0 %642  ;;  %v335_v37 = vmul.f32 %v305_v59, %v1108_v21 }
 0x182   :  { %v673_v18 = vmul.f32 %v643_v36, %v1108_v21 }
 0x183   :  { %v343_v10 = vmax.f32 %v335_v37, 1e-12 }
 0x185   :  { %266 = vadd.xlane.f32.xlu1 %v265_v11  ;;  %434 = vadd.xlane.f32.xlu0 %v433_v43  ;;  %873 = vrcp.f32 %v343_v10 }
 0x189   :  { %606 = vadd.xlane.f32.xlu1 %v605_v14  ;;  %263 = vadd.xlane.f32.xlu0 %v262_v8 }
 0x18d   :  { %443 = vadd.xlane.f32.xlu1 %v442_v19  ;;  %603 = vadd.xlane.f32.xlu0 %v602_v49  ;;  %v512_v19 = vmax.f32 %v504_v45, 1e-12 }
 0x191   :  { %446 = vadd.xlane.f32.xlu1 %v445_v63  ;;  %440 = vadd.xlane.f32.xlu0 %v439_v50  ;;  %v681_v63 = vmax.f32 %v673_v18, 1e-12 }
 0x195   :  { %615 = vadd.xlane.f32.xlu1 %v614_v62  ;;  %269 = vadd.xlane.f32.xlu0 %v268_v30 }
 0x199   :  { %609 = vadd.xlane.f32.xlu0 %v608_v53 }
 0x19d   :  { %612 = vadd.xlane.f32.xlu0 %v611_v56 }
 0x19e   :  { %s786_s26 = spop %785 }
 0x1a8   :  { %v308_v16 = vpop.xlane.xlu1 %307 }
 0x1a9   :  { %v336_v1 = vmul.f32 %v308_v16, %v1114_v23 }
 0x1ab   :  { %v344_v14 = vmax.f32 %v336_v1, 1e-12 }
 0x1ac   :  { %v477_v4 = vpop.xlane.xlu1 %476 }
 0x1ad   :  { %v505_v46 = vmul.f32 %v477_v4, %v1114_v23  ;;  %875 = vrcp.f32 %v344_v14 }
 0x1ae   :  { %877 = vrcp.f32 %v345_v47 }
 0x1af   :  { %v513_v49 = vmax.f32 %v505_v46, 1e-12  ;;  %879 = vrcp.f32 %v512_v19 }
 0x1b0   :  { %v480_v33 = vpop.xlane.xlu1 %479  ;;  %881 = vrcp.f32 %v346_v61 }
 0x1b1   :  { %v506_v48 = vmul.f32 %v480_v33, %v1106_v20  ;;  %883 = vrcp.f32 %v513_v49 }
 0x1b2   :  { %885 = vrcp.f32 %v681_v63 }
 0x1b3   :  { %v514_v50 = vmax.f32 %v506_v48, 1e-12 }
 0x1b4   :  { %v646_v60 = vpop.xlane.xlu1 %645 }
 0x1b5   :  { %v674_v35 = vmul.f32 %v646_v60, %v1114_v23  ;;  %887 = vrcp.f32 %v514_v50 }
 0x1b7   :  { %v682_v62 = vmax.f32 %v674_v35, 1e-12 }
 0x1b8   :  { %v483_v2 = vpop.xlane.xlu1 %482 }
 0x1b9   :  { %v507_v44 = vmul.f32 %v483_v2, %v1112_v22  ;;  %889 = vrcp.f32 %v682_v62 }
 0x1bb   :  { %v515_v23 = vmax.f32 %v507_v44, 1e-12 }
 0x1bc   :  { %v320_v12 = vpop.xlane.xlu1 %319 }
 0x1bd   :  { %v340_v31 = vmul.f32 %v320_v12, %v1118_v24  ;;  %891 = vrcp.f32 %v515_v23  ;;  %v874_v12 = vpop.eup %873 }
 0x1bf   :  { %v348_v52 = vmax.f32 %v340_v31, 1e-12 }
 0x1c0   :  { %v652_v13 = vpop.xlane.xlu1 %651 }
 0x1c1   :  { %v676_v57 = vmul.f32 %v652_v13, %v1112_v22  ;;  %893 = vrcp.f32 %v348_v52 }
 0x1c3   :  { %v684_v33 = vmax.f32 %v676_v57, 1e-12 }
 0x1c4   :  { %v489_v38 = vpop.xlane.xlu1 %488 }
 0x1c5   :  { %v509_v30 = vmul.f32 %v489_v38, %v1118_v24  ;;  %v327_v38 = vmul.f32 %v1206_v32, %v1206_v32 }
 0x1c7   :  { %v517_v59 = vmax.f32 %v509_v30, 1e-12 }
 0x1c8   :  { %v326_v29 = vpop.xlane.xlu1 %325 }
 0x1c9   :  { %v342_v16 = vmul.f32 %v326_v29, %v1124_v26 }
 0x1cb   :  { %v350_v7 = vmax.f32 %v342_v16, 1e-12 }
 0x1cc   :  { %v1278_v39 = vpop.xlane.xlu1 %657 }
 0x1cd   :  { %v678_v32 = vmul.f32 %v1278_v39, %v1118_v24 }
 0x1cf   :  { %v686_v49 = vmax.f32 %v678_v32, 1e-12 }
 0x1d0   :  { %v1280_v40 = vpop.xlane.xlu1 %660 }
 0x1d1   :  { %v679_v14 = vmul.f32 %v1280_v40, %v1126_v27 }
 0x1d3   :  { %v687_v44 = vmax.f32 %v679_v14, 1e-12 }
 0x1d4   :  { %v1285_v41 = vpop.xlane.xlu1 %663 }
 0x1d5   :  { %v680_v57 = vmul.f32 %v1285_v41, %v1124_v26 }
 0x1de   :  { %v317_v34 = vpop.xlane.xlu0 %316 }
 0x1df   :  { %v339_v51 = vmul.f32 %v317_v34, %v1120_v25 }
 0x1e1   :  { %v347_v4 = vmax.f32 %v339_v51, 1e-12 }
 0x1e2   :  { %v649_v17 = vpop.xlane.xlu0 %648 }
 0x1e3   :  { %v675_v22 = vmul.f32 %v649_v17, %v1106_v20  ;;  %895 = vrcp.f32 %v347_v4  ;;  %v876_v17 = vpop.eup %875 }
 0x1e4   :  { %897 = vrcp.f32 %v684_v33  ;;  %v878_v10 = vpop.eup %877 }
 0x1e5   :  { %899 = vrcp.f32 %v517_v59  ;;  %v683_v34 = vmax.f32 %v675_v22, 1e-12  ;;  %v880_v55 = vpop.eup %879 }
 0x1e6   :  { %v486_v3 = vpop.xlane.xlu0 %485  ;;  %v882_v47 = vpop.eup %881 }
 0x1e7   :  { %v508_v53 = vmul.f32 %v486_v3, %v1120_v25  ;;  %v884_v48 = vpop.eup %883 }
 0x1e8   :  { %v886_v40 = vpop.eup %885 }
 0x1e9   :  { %v516_v60 = vmax.f32 %v508_v53, 1e-12  ;;  %v888_v35 = vpop.eup %887 }
 0x1ea   :  { %v323_v58 = vpop.xlane.xlu0 %322 }
 0x1eb   :  { %v341_v0 = vmul.f32 %v323_v58, %v1126_v27  ;;  %901 = vrcp.f32 %v516_v60  ;;  %v352_v58 = vmul.f32 %v874_v12, %v327_v38 }
 0x1ec   :  { %903 = vrcp.f32 %v350_v7  ;;  %v688_v7 = vmax.f32 %v680_v57, 1e-12 }
 0x1ed   :  { %v349_v3 = vmax.f32 %v341_v0, 1e-12  ;;  %905 = vrcp.f32 %v683_v34  ;;  %v367_v61 = vsel %vm181_vm1, %v352_v58, 0.0 }
 0x1ee   :  { %v1282_v28 = vpop.xlane.xlu0 %654 }
 0x1ef   :  { %907 = vrcp.f32 %v349_v3 }
 0x1f2   :  { %v492_v42 = vpop.xlane.xlu0 %491 }
 0x1f3   :  { %v510_v13 = vmul.f32 %v492_v42, %v1126_v27 }
 0x1f5   :  { %v518_v6 = vmax.f32 %v510_v13, 1e-12 }
 0x1f6   :  { %v1289_v11 = vpop.xlane.xlu1 %425  ;;  %v495_v43 = vpop.xlane.xlu0 %494 }
 0x1f7   :  { %v511_v20 = vmul.f32 %v495_v43, %v1124_v26  ;;  %v677_v43 = vmul.f32 %v1282_v28, %v1120_v25  ;;  %v496_v46 = vmul.f32 %v1289_v11, %v1289_v11  ;;  %909 = vrcp.f32 %v518_v6 }
 0x1f9   :  { %v519_v18 = vmax.f32 %v511_v20, 1e-12  ;;  %v685_v63 = vmax.f32 %v677_v43, 1e-12  ;;  %v521_v31 = vmul.f32 %v880_v55, %v496_v46 }
 0x1fa   :  { %v252_v8 = vpop.xlane.xlu0 %251  ;;  %v1295_v15 = vpop.xlane.xlu1 %257 }
 0x1fb   :  { %v328_v36 = vmul.f32 %v252_v8, %v252_v8  ;;  %v330_v24 = vmul.f32 %v1295_v15, %v1295_v15  ;;  %911 = vrcp.f32 %v519_v18  ;;  %v536_v26 = vsel %vm181_vm1, %v521_v31, 0.0 }
 0x1fc   :  { %913 = vrcp.f32 %v686_v49 }
 0x1fd   :  { %v354_v42 = vmul.f32 %v876_v17, %v328_v36  ;;  %v358_v30 = vmul.f32 %v882_v47, %v330_v24  ;;  %915 = vrcp.f32 %v685_v63 }
 0x1fe   :  { %v1301_v5 = vpop.xlane.xlu1 %594  ;;  %v255_v21 = vpop.xlane.xlu0 %254  ;;  %917 = vrcp.f32 %v687_v44 }
 0x1ff   :  { %v329_v29 = vmul.f32 %v255_v21, %v255_v21  ;;  %v368_v25 = vsel %vm181_vm1, %v354_v42, 0.0  ;;  %v890_v21 = vpop.eup %889  ;;  %v665_v52 = vmul.f32 %v1301_v5, %v1301_v5  ;;  %v372_v13 = vsel %vm181_vm1, %v358_v30, 0.0 }
 0x200   :  { %v892_v62 = vpop.eup %891  ;;  %v369_v23 = vadd.f32 %v368_v25, %v367_v61  ;;  %919 = vrcp.f32 %v688_v7 }
 0x201   :  { %v356_v8 = vmul.f32 %v878_v10, %v329_v29  ;;  %v894_v16 = vpop.eup %893  ;;  %v690_v29 = vmul.f32 %v886_v40, %v665_v52 }
 0x202   :  { %v1307_v54 = vpop.xlane.xlu1 %260  ;;  %v429_v56 = vpop.xlane.xlu0 %428 }
 0x203   :  { %v497_v45 = vmul.f32 %v429_v56, %v429_v56  ;;  %v370_v50 = vsel %vm181_vm1, %v356_v8, 0.0  ;;  %v331_v15 = vmul.f32 %v1307_v54, %v1307_v54  ;;  %v896_v60 = vpop.eup %895 }
 0x204   :  { %v371_v54 = vadd.f32 %v370_v50, %v369_v23 }
 0x205   :  { %v523_v28 = vmul.f32 %v884_v48, %v497_v45  ;;  %v360_v41 = vmul.f32 %v896_v60, %v331_v15 }
 0x206   :  { %v1312_v2 = vpop.xlane.xlu1 %600  ;;  %v432_v9 = vpop.xlane.xlu0 %431 }
 0x207   :  { %v498_v19 = vmul.f32 %v432_v9, %v432_v9  ;;  %v537_v4 = vsel %vm181_vm1, %v523_v28, 0.0  ;;  %v898_v9 = vpop.eup %897  ;;  %v667_v10 = vmul.f32 %v1312_v2, %v1312_v2  ;;  %v374_v45 = vsel %vm181_vm1, %v360_v41, 0.0 }
 0x208   :  { %v900_v5 = vpop.eup %899  ;;  %v538_v36 = vadd.f32 %v537_v4, %v536_v26 }
 0x209   :  { %v525_v51 = vmul.f32 %v888_v35, %v498_v19  ;;  %v902_v20 = vpop.eup %901 }
 0x20a   :  { %v438_v37 = vpop.xlane.xlu1 %437  ;;  %v598_v1 = vpop.xlane.xlu0 %597 }
 0x20b   :  { %v666_v33 = vmul.f32 %v598_v1, %v598_v1  ;;  %v500_v0 = vmul.f32 %v438_v37, %v438_v37  ;;  %v539_v12 = vsel %vm181_vm1, %v525_v51, 0.0  ;;  %v904_v37 = vpop.eup %903  ;;  %v373_v1 = vadd.f32 %v372_v13, %v371_v54 }
 0x20c   :  { %v540_v6 = vadd.f32 %v539_v12, %v538_v36  ;;  %v906_v43 = vpop.eup %905 }
 0x20d   :  { %v692_v17 = vmul.f32 %v890_v21, %v666_v33  ;;  %v529_v42 = vmul.f32 %v902_v20, %v500_v0  ;;  %v908_v8 = vpop.eup %907  ;;  %v375_v40 = vadd.f32 %v374_v45, %v373_v1  ;;  %v694_v25 = vmul.f32 %v906_v43, %v667_v10 }
 0x20e   :  { %v267_v39 = vpop.xlane.xlu1 %266  ;;  %v435_v27 = vpop.xlane.xlu0 %434 }
 0x20f   :  { %v499_v11 = vmul.f32 %v435_v27, %v435_v27  ;;  %v333_v55 = vmul.f32 %v267_v39, %v267_v39  ;;  %v706_v19 = vsel %vm181_vm1, %v692_v17, 0.0  ;;  %v910_v2 = vpop.eup %909  ;;  %v705_v27 = vsel %vm181_vm1, %v690_v29, 0.0 }
 0x210   :  { %v543_v39 = vsel %vm181_vm1, %v529_v42, 0.0  ;;  %v912_v44 = vpop.eup %911  ;;  %v707_v63 = vadd.f32 %v706_v19, %v705_v27  ;;  %v708_v23 = vsel %vm181_vm1, %v694_v25, 0.0 }
 0x211   :  { %v527_v59 = vmul.f32 %v892_v62, %v499_v11  ;;  %v364_v28 = vmul.f32 %v908_v8, %v333_v55  ;;  %v914_v52 = vpop.eup %913 }
 0x212   :  { %v607_v53 = vpop.xlane.xlu1 %606  ;;  %v264_v56 = vpop.xlane.xlu0 %263 }
 0x213   :  { %v332_v22 = vmul.f32 %v264_v56, %v264_v56  ;;  %v541_v3 = vsel %vm181_vm1, %v527_v59, 0.0  ;;  %v669_v15 = vmul.f32 %v607_v53, %v607_v53  ;;  %v378_v56 = vsel %vm181_vm1, %v364_v28, 0.0  ;;  %v916_v59 = vpop.eup %915 }
 0x214   :  { %v542_v46 = vadd.f32 %v541_v3, %v540_v6 }
 0x215   :  { %v362_v58 = vmul.f32 %v894_v16, %v332_v22  ;;  %v709_v22 = vadd.f32 %v708_v23, %v707_v63  ;;  %v698_v26 = vmul.f32 %v916_v59, %v669_v15 }
 0x216   :  { %v444_v38 = vpop.xlane.xlu1 %443  ;;  %v604_v34 = vpop.xlane.xlu0 %603  ;;  %v544_v21 = vadd.f32 %v543_v39, %v542_v46 }
 0x217   :  { %v502_v32 = vmul.f32 %v444_v38, %v444_v38  ;;  %v668_v14 = vmul.f32 %v604_v34, %v604_v34  ;;  %v376_v48 = vsel %vm181_vm1, %v362_v58, 0.0  ;;  %v712_v17 = vsel %vm181_vm1, %v698_v26, 0.0 }
 0x218   :  { %v377_v31 = vadd.f32 %v376_v48, %v375_v40 }
 0x219   :  { %v533_v11 = vmul.f32 %v910_v2, %v502_v32  ;;  %v696_v35 = vmul.f32 %v898_v9, %v668_v14  ;;  %v918_v9 = vpop.eup %917 }
 0x21a   :  { %v447_v47 = vpop.xlane.xlu1 %446  ;;  %v441_v18 = vpop.xlane.xlu0 %440  ;;  %v379_v0 = vadd.f32 %v378_v56, %v377_v31 }
 0x21b   :  { %v503_v61 = vmul.f32 %v447_v47, %v447_v47  ;;  %v501_v24 = vmul.f32 %v441_v18, %v441_v18  ;;  %v547_v16 = vsel %vm181_vm1, %v533_v11, 0.0  ;;  %v710_v4 = vsel %vm181_vm1, %v696_v35, 0.0  ;;  %v920_v29 = vpop.eup %919 }
 0x21c   :  { %v711_v7 = vadd.f32 %v710_v4, %v709_v22 }
 0x21d   :  { %v531_v49 = vmul.f32 %v900_v5, %v501_v24  ;;  %v535_v51 = vmul.f32 %v912_v44, %v503_v61 }
 0x21e   :  { %v270_v50 = vpop.xlane.xlu0 %269  ;;  %v616_v60 = vpop.xlane.xlu1 %615 }
 0x21f   :  { %v545_v62 = vsel %vm181_vm1, %v531_v49, 0.0  ;;  %v334_v57 = vmul.f32 %v270_v50, %v270_v50  ;;  %v549_v41 = vsel %vm181_vm1, %v535_v51, 0.0  ;;  %v672_v38 = vmul.f32 %v616_v60, %v616_v60 }
 0x220   :  { %v546_v30 = vadd.f32 %v545_v62, %v544_v21 }
 0x221   :  { %v366_v33 = vmul.f32 %v904_v37, %v334_v57  ;;  %v713_v37 = vadd.f32 %v712_v17, %v711_v7  ;;  %v704_v1 = vmul.f32 %v920_v29, %v672_v38 }
 0x222   :  { %v610_v54 = vpop.xlane.xlu0 %609  ;;  %v548_v53 = vadd.f32 %v547_v16, %v546_v30 }
 0x223   :  { %v380_v12 = vsel %vm181_vm1, %v366_v33, 0.0  ;;  %v670_v5 = vmul.f32 %v610_v54, %v610_v54  ;;  %v718_v55 = vsel %vm181_vm1, %v704_v1, 0.0 }
 0x224   :  { %v550_v13 = vadd.f32 %v549_v41, %v548_v53  ;;  %v381_v36 = vadd.f32 %v380_v12, %v379_v0 }
 0x225   :  { %v700_v34 = vmul.f32 %v914_v52, %v670_v5 }
 0x226   :  { %551 = vadd.xlane.f32.xlu1 %v550_v13  ;;  %382 = vadd.xlane.f32.xlu0 %v381_v36  ;;  %v613_v20 = vpop.xlane.xlu0 %612 }
 0x227   :  { %v714_v3 = vsel %vm181_vm1, %v700_v34, 0.0  ;;  %v671_v58 = vmul.f32 %v613_v20, %v613_v20 }
 0x228   :  { %v715_v6 = vadd.f32 %v714_v3, %v713_v37 }
 0x229   :  { %v702_v10 = vmul.f32 %v918_v9, %v671_v58 }
 0x22b   :  { %v716_v42 = vsel %vm181_vm1, %v702_v10, 0.0 }
 0x22c   :  { %v717_v45 = vadd.f32 %v716_v42, %v715_v6 }
 0x22e   :  { %v719_v32 = vadd.f32 %v718_v55, %v717_v45 }
 0x230   :  { %720 = vadd.xlane.f32.xlu0 %v719_v32 }
 0x2af   :  { %v552_v14 = vpop.xlane.xlu1 %551  ;;  %v383_v43 = vpop.xlane.xlu0 %382 }
 0x2b0   :  { %v553_v46 = vrot.slane %v552_v14, 4  ;;  %v384_v47 = vrot.slane %v383_v43, 4 }
 0x2b2   :  { %v554_v18 = vadd.f32 %v553_v46, %v552_v14  ;;  %v385_v8 = vadd.f32 %v384_v47, %v383_v43 }
 0x2b4   :  { %v555_v19 = vrot.slane %v554_v18, 2  ;;  %v386_v48 = vrot.slane %v385_v8, 2 }
 0x2b6   :  { %v556_v61 = vadd.f32 %v555_v19, %v554_v18  ;;  %v387_v24 = vadd.f32 %v386_v48, %v385_v8 }
 0x2b8   :  { %v388_v2 = vrot.slane %v387_v24, 1  ;;  %v557_v27 = vrot.slane %v556_v61, 1 }
 0x2b9   :  { %v721_v40 = vpop.xlane.xlu0 %720 }
 0x2ba   :  { %v722_v25 = vrot.slane %v721_v40, 4  ;;  %v389_v39 = vadd.f32 %v388_v2, %v387_v24  ;;  %v558_v28 = vadd.f32 %v557_v27, %v556_v61 }
 0x2bc   :  { %v723_v11 = vadd.f32 %v722_v25, %v721_v40  ;;  %787 = vpush %v389_v39 }
 0x2bd   :  { %789 = vpush %v558_v28 }
 0x2be   :  { %v724_v35 = vrot.slane %v723_v11, 2 }
 0x2c0   :  { %v725_v49 = vadd.f32 %v724_v35, %v723_v11 }
 0x2c2   :  { %v726_v44 = vrot.slane %v725_v49, 1 }
 0x2c4   :  { %v727_v63 = vadd.f32 %v726_v44, %v725_v49 }
 0x2c6   :  { %791 = vpush %v727_v63 }
 0x2ed   :  { %s788_s27 = spop %787 }
 0x2ee   :  { %s391_s28 = sadd.f32 %s788_s27, %s786_s26  ;;  %s790_s29 = spop %789 }
 0x2f0   :  { %s560_s30 = sadd.f32 %s790_s29, %s391_s28 }
 0x2f7   :  { %s792_s5 = spop %791 }
 0x2f8   :  { %s729_s6 = sadd.f32 %s792_s5, %s560_s30 }
 0x2fa   :  { %v730_v31 = vstv %s729_s6 }
 0x2fb   :  { %732 = vst.msk [vmem:[#allocation2] sm:$0x1] %vm731_vm2, %v730_v31 }
 0x2fc   :  { %932 = shalt.err (!%p929_p4)
}
 0x2fd   :  { %742 = dma.vmem_to_hbm [thread:$0]  %s740_s4, 16, %s1365_s2, [#allocation3]  }
 0x2fe   :  { %941 = dma.done.wait [#allocation3], 16  }
 0x2ff   :  { %942 = vsyncadd [#allocation3], 4294967280 }
 0x300   :  { %746 = vsyncpa [#allocation3], 1 }

</bundles_post_ra>
